<compile_context>
chip_gen: v6e
topology: v6e:2x2x1
jax: 0.10.0
libtpu: 0.0.40
codegen_flags: <defaults>
</compile_context>

<pallas_src>
from functools import partial

import jax
import jax.numpy as jnp
import numpy as np
from jax.experimental import pallas as pl
from jax.experimental.pallas import tpu as pltpu
from jax.scipy.linalg import block_diag

SEQ = 50  # the module hard-codes seq length 50


def _layernorm(x, w, b, eps=1e-5):
    # x: (N, D); w, b: (1, D). Matches nn.LayerNorm default eps=1e-5.
    mean = jnp.mean(x, axis=-1, keepdims=True)
    var = jnp.mean((x - mean) ** 2, axis=-1, keepdims=True)
    return (x - mean) * jax.lax.rsqrt(var + eps) * w + b


def transformer_kernel(x_ref, ln_ref, wqkv_ref, bqkv_ref, mlpw_ref, mlpb_ref,
                       o_ref, a_sc, *, d_model, head, seq, bpg):
    D = d_model
    dh = D // head
    N = bpg * seq

    xf = x_ref[...].reshape(N, D)                     # (bpg*S, D)

    ln1w = ln_ref[0:1, :]
    ln1b = ln_ref[1:2, :]
    ln2w = ln_ref[2:3, :]
    ln2b = ln_ref[3:4, :]

    normed1 = _layernorm(xf, ln1w, ln1b)              # (N, D)

    # Fused QKV projection: one lane-dense matmul. The sqrt(d_model) score
    # scale is already folded into the Q columns of wqkv/bqkv on the host.
    qkv = jnp.dot(normed1, wqkv_ref[...],
                  preferred_element_type=jnp.float32) + bqkv_ref[...]  # (N, 3D)
    q_all = qkv[:, 0 * D:1 * D]                       # (N, D), already * sqrt(D)
    k_all = qkv[:, 1 * D:2 * D]
    v_all = qkv[:, 2 * D:3 * D]

    # Per-batch-element, per-head attention. bpg/head are tiny static Python
    # ints, so these unrolled loops stay fully visible to the LLO scheduler.
    for b in range(bpg):
        r0, r1 = b * seq, (b + 1) * seq
        for h in range(head):
            c0, c1 = h * dh, (h + 1) * dh
            q = q_all[r0:r1, c0:c1]                   # (S, dh)
            k = k_all[r0:r1, c0:c1]                   # (S, dh)
            v = v_all[r0:r1, c0:c1]                   # (S, dh)
            # q @ k.T without an in-kernel transpose: contract dh of both.
            scores = jax.lax.dot_general(
                q, k, (((1,), (1,)), ((), ())),
                preferred_element_type=jnp.float32)   # (S, S)
            scores = scores - jnp.max(scores, axis=-1, keepdims=True)
            p = jnp.exp(scores)
            inv = pl.reciprocal(jnp.sum(p, axis=-1, keepdims=True), approx=True)
            attn = p * inv
            a_sc[r0:r1, c0:c1] = jnp.dot(attn, v,
                                         preferred_element_type=jnp.float32)

    y = xf + a_sc[...]                                # residual 1
    normed2 = _layernorm(y, ln2w, ln2b)
    mlp_out = jnp.dot(normed2, mlpw_ref[...],
                      preferred_element_type=jnp.float32) + mlpb_ref[...]
    o_ref[...] = (y + mlp_out).reshape(bpg, seq, D)   # residual 2


def transformer_forward(x, params, *, d_model, head):
    B, S, D = x.shape
    assert D == d_model and D % head == 0
    scale = d_model ** 0.5  # reproduces PyTorch `/ d_model**(-0.5)` exactly

    (ln1w, ln1b, wq, bq, wk, bk, wv, bv, ln2w, ln2b, mlpw, mlpb) = params

    # --- Host-side parameter preprocessing (one-time, outside the kernel) ----
    # PyTorch Linear is y = x @ W.T + b, so each per-head diagonal block is W_h.T.
    wq_t = jnp.transpose(wq, (0, 2, 1))
    wk_t = jnp.transpose(wk, (0, 2, 1))
    wv_t = jnp.transpose(wv, (0, 2, 1))
    wqkv = jnp.concatenate(
        [block_diag(*(scale * wq_t)),                 # Q block-diag * sqrt(D)
         block_diag(*wk_t),
         block_diag(*wv_t)], axis=1).astype(jnp.float32)            # (D, 3D)
    bqkv = jnp.concatenate(
        [scale * bq.reshape(1, D), bk.reshape(1, D), bv.reshape(1, D)],
        axis=1).astype(jnp.float32)                                  # (1, 3D)

    mlpw_t = mlpw.T.astype(jnp.float32)                              # (D, D)
    ln_params = jnp.concatenate([ln1w, ln1b, ln2w, ln2b], axis=0)    # (4, D)

    # Batch tiling: >=2 parallel grid steps when possible (v7x has 2 TCs),
    # folding extra batch into each step to amortize per-step overhead.
    if B >= 2 and B % 2 == 0:
        bpg = B // 2
    else:
        bpg = 1
    num_steps = B // bpg

    def full_spec(shape):
        return pl.BlockSpec(shape, lambda i: (0,) * len(shape))

    in_specs = [
        pl.BlockSpec((bpg, S, D), lambda i: (i, 0, 0)),   # x
        full_spec((4, D)),                                # packed LN params
        full_spec((D, 3 * D)),                            # fused QKV weight
        full_spec((1, 3 * D)),                            # fused QKV bias
        full_spec((D, D)),                                # mlp weight (pre-T)
        full_spec((1, D)),                                # mlp bias
    ]

    return pl.pallas_call(
        partial(transformer_kernel, d_model=d_model, head=head, seq=S, bpg=bpg),
        out_shape=jax.ShapeDtypeStruct((B, S, D), jnp.float32),
        grid=(num_steps,),
        in_specs=in_specs,
        out_specs=pl.BlockSpec((bpg, S, D), lambda i: (i, 0, 0)),
        scratch_shapes=[pltpu.VMEM((bpg * S, D), jnp.float32)],
        compiler_params=pltpu.CompilerParams(dimension_semantics=("parallel",)),
    )(x, ln_params, wqkv, bqkv, mlpw_t, mlpb)


def transformer_reference(x, params, *, d_model, head):
    (ln1w, ln1b, wq, bq, wk, bk, wv, bv, ln2w, ln2b, mlpw, mlpb) = params
    dh = d_model // head
    hp = jax.lax.Precision.HIGHEST

    def ln(v, w, b, eps=1e-5):
        m = jnp.mean(v, axis=-1, keepdims=True)
        var = jnp.mean((v - m) ** 2, axis=-1, keepdims=True)
        return (v - m) * jax.lax.rsqrt(var + eps) * w + b

    n1 = ln(x, ln1w, ln1b)
    outs = []
    for h in range(head):
        xh = n1[:, :, h * dh:(h + 1) * dh]
        q = jnp.einsum('bsd,ed->bse', xh, wq[h], precision=hp) + bq[h]
        k = jnp.einsum('bsd,ed->bse', xh, wk[h], precision=hp) + bk[h]
        v = jnp.einsum('bsd,ed->bse', xh, wv[h], precision=hp) + bv[h]
        s = jnp.einsum('bqd,bkd->bqk', q, k, precision=hp) * (d_model ** 0.5)
        attn = jax.nn.softmax(s, axis=-1)
        outs.append(jnp.einsum('bqk,bkd->bqd', attn, v, precision=hp))
    a = jnp.concatenate(outs, axis=-1)
    y = x + a
    n2 = ln(y, ln2w, ln2b)
    mlp_out = jnp.einsum('bsd,ed->bse', n2, mlpw, precision=hp) + mlpb
    return y + mlp_out


def make_params(key, d_model, head):
    dh = d_model // head
    keys = jax.random.split(key, 12)
    f32 = jnp.float32
    ln1w = 1.0 + 0.1 * jax.random.normal(keys[8], (1, d_model), f32)
    ln1b = 0.1 * jax.random.normal(keys[9], (1, d_model), f32)
    wq = 0.1 * jax.random.normal(keys[0], (head, dh, dh), f32)
    bq = 0.1 * jax.random.normal(keys[1], (head, 1, dh), f32)
    wk = 0.1 * jax.random.normal(keys[2], (head, dh, dh), f32)
    bk = 0.1 * jax.random.normal(keys[3], (head, 1, dh), f32)
    wv = 0.1 * jax.random.normal(keys[4], (head, dh, dh), f32)
    bv = 0.1 * jax.random.normal(keys[5], (head, 1, dh), f32)
    ln2w = 1.0 + 0.1 * jax.random.normal(keys[10], (1, d_model), f32)
    ln2b = 0.1 * jax.random.normal(keys[11], (1, d_model), f32)
    mlpw = 0.1 * jax.random.normal(keys[6], (d_model, d_model), f32)
    mlpb = 0.1 * jax.random.normal(keys[7], (1, d_model), f32)
    return (ln1w, ln1b, wq, bq, wk, bk, wv, bv, ln2w, ln2b, mlpw, mlpb)


if __name__ == "__main__":
    d_model, head, B = 32, 4, 2
    key = jax.random.PRNGKey(0)
    kx, kp = jax.random.split(key)
    x = jax.random.normal(kx, (B, SEQ, d_model), jnp.float32)
    params = make_params(kp, d_model, head)

    out = transformer_forward(x, params, d_model=d_model, head=head)
    out = jax.block_until_ready(out)

    ref = transformer_reference(x, params, d_model=d_model, head=head)
    np.testing.assert_allclose(np.asarray(out), np.asarray(ref), rtol=1e-2, atol=1e-2)

    print("KERNEL_OK")
</pallas_src>

<mosaic_0001>
module attributes {stable_mosaic.version = 11 : i64} {
  func.func @transformer_kernel(%arg0: i32, %arg1: memref<1x50x32xf32, #tpu.memory_space<vmem>>, %arg2: memref<4x32xf32, #tpu.memory_space<vmem>>, %arg3: memref<32x96xf32, #tpu.memory_space<vmem>>, %arg4: memref<1x96xf32, #tpu.memory_space<vmem>>, %arg5: memref<32x32xf32, #tpu.memory_space<vmem>>, %arg6: memref<1x32xf32, #tpu.memory_space<vmem>>, %arg7: memref<1x50x32xf32, #tpu.memory_space<vmem>>, %arg8: memref<50x32xf32, #tpu.memory_space<vmem>>) attributes {dimension_semantics = [#tpu.dimension_semantics<parallel>], iteration_bounds = array<i64: 2>, scalar_prefetch = 0 : i64, scratch_operands = 1 : i64, tpu.core_type = #tpu.core_type<tc>, window_params = [{transform_indices = @transform_0, window_bounds = array<i64: 1, 50, 32>}, {pipeline_mode = #tpu.pipeline_mode<synchronous>, transform_indices = @transform_1, window_bounds = array<i64: 4, 32>}, {pipeline_mode = #tpu.pipeline_mode<synchronous>, transform_indices = @transform_2, window_bounds = array<i64: 32, 96>}, {pipeline_mode = #tpu.pipeline_mode<synchronous>, transform_indices = @transform_3, window_bounds = array<i64: 1, 96>}, {pipeline_mode = #tpu.pipeline_mode<synchronous>, transform_indices = @transform_4, window_bounds = array<i64: 32, 32>}, {pipeline_mode = #tpu.pipeline_mode<synchronous>, transform_indices = @transform_5, window_bounds = array<i64: 1, 32>}, {transform_indices = @transform_6, window_bounds = array<i64: 1, 50, 32>}]} {
    %c0 = arith.constant 0 : index
    %c0_0 = arith.constant 0 : index
    %c0_1 = arith.constant 0 : index
    %0 = vector.load %arg1[%c0, %c0_0, %c0_1] : memref<1x50x32xf32, #tpu.memory_space<vmem>>, vector<1x50x32xf32>
    %1 = vector.shape_cast %0 : vector<1x50x32xf32> to vector<50x32xf32>
    %c0_2 = arith.constant 0 : index
    %c0_3 = arith.constant 0 : index
    %2 = vector.load %arg2[%c0_2, %c0_3] : memref<4x32xf32, #tpu.memory_space<vmem>>, vector<1x32xf32>
    %c1 = arith.constant 1 : index
    %c0_4 = arith.constant 0 : index
    %3 = vector.load %arg2[%c1, %c0_4] : memref<4x32xf32, #tpu.memory_space<vmem>>, vector<1x32xf32>
    %c2 = arith.constant 2 : index
    %c0_5 = arith.constant 0 : index
    %4 = vector.load %arg2[%c2, %c0_5] : memref<4x32xf32, #tpu.memory_space<vmem>>, vector<1x32xf32>
    %c3 = arith.constant 3 : index
    %c0_6 = arith.constant 0 : index
    %5 = vector.load %arg2[%c3, %c0_6] : memref<4x32xf32, #tpu.memory_space<vmem>>, vector<1x32xf32>
    %cst = arith.constant dense<0.000000e+00> : vector<50xf32>
    %6 = vector.multi_reduction <add>, %1, %cst [1] : vector<50x32xf32> to vector<50xf32>
    %7 = vector.shape_cast %6 : vector<50xf32> to vector<50x1xf32>
    %cst_7 = arith.constant 3.200000e+01 : f32
    %8 = vector.broadcast %cst_7 : f32 to vector<50x1xf32>
    %9 = arith.divf %7, %8 : vector<50x1xf32>
    %10 = vector.broadcast %9 : vector<50x1xf32> to vector<50x32xf32>
    %11 = arith.subf %1, %10 : vector<50x32xf32>
    %12 = arith.mulf %11, %11 : vector<50x32xf32>
    %cst_8 = arith.constant dense<0.000000e+00> : vector<50xf32>
    %13 = vector.multi_reduction <add>, %12, %cst_8 [1] : vector<50x32xf32> to vector<50xf32>
    %14 = vector.shape_cast %13 : vector<50xf32> to vector<50x1xf32>
    %cst_9 = arith.constant 3.200000e+01 : f32
    %15 = vector.broadcast %cst_9 : f32 to vector<50x1xf32>
    %16 = arith.divf %14, %15 : vector<50x1xf32>
    %17 = vector.broadcast %9 : vector<50x1xf32> to vector<50x32xf32>
    %18 = arith.subf %1, %17 : vector<50x32xf32>
    %cst_10 = arith.constant 9.99999974E-6 : f32
    %19 = vector.broadcast %cst_10 : f32 to vector<50x1xf32>
    %20 = arith.addf %16, %19 : vector<50x1xf32>
    %21 = math.rsqrt %20 : vector<50x1xf32>
    %22 = vector.broadcast %21 : vector<50x1xf32> to vector<50x32xf32>
    %23 = arith.mulf %18, %22 : vector<50x32xf32>
    %24 = vector.broadcast %2 : vector<1x32xf32> to vector<50x32xf32>
    %25 = arith.mulf %23, %24 : vector<50x32xf32>
    %26 = vector.broadcast %3 : vector<1x32xf32> to vector<50x32xf32>
    %27 = arith.addf %25, %26 : vector<50x32xf32>
    %c0_11 = arith.constant 0 : index
    %c0_12 = arith.constant 0 : index
    %28 = vector.load %arg3[%c0_11, %c0_12] : memref<32x96xf32, #tpu.memory_space<vmem>>, vector<32x96xf32>
    %cst_13 = arith.constant dense<0.000000e+00> : vector<50x96xf32>
    %29 = tpu.matmul %27, %28, %cst_13 {dimension_numbers = #tpu.dot_dimension_numbers<[1], [0], [0], [1], [0, 0, 1, 1], [], []>} : vector<50x32xf32>, vector<32x96xf32>, vector<50x96xf32> -> vector<50x96xf32>
    %c0_14 = arith.constant 0 : index
    %c0_15 = arith.constant 0 : index
    %30 = vector.load %arg4[%c0_14, %c0_15] : memref<1x96xf32, #tpu.memory_space<vmem>>, vector<1x96xf32>
    %31 = vector.broadcast %30 : vector<1x96xf32> to vector<50x96xf32>
    %32 = arith.addf %29, %31 : vector<50x96xf32>
    %33 = vector.extract_strided_slice %32 {offsets = [0, 0], sizes = [50, 32], strides = [1, 1]} : vector<50x96xf32> to vector<50x32xf32>
    %34 = vector.extract_strided_slice %32 {offsets = [0, 32], sizes = [50, 32], strides = [1, 1]} : vector<50x96xf32> to vector<50x32xf32>
    %35 = vector.extract_strided_slice %32 {offsets = [0, 64], sizes = [50, 32], strides = [1, 1]} : vector<50x96xf32> to vector<50x32xf32>
    %36 = vector.extract_strided_slice %33 {offsets = [0, 0], sizes = [50, 8], strides = [1, 1]} : vector<50x32xf32> to vector<50x8xf32>
    %37 = vector.extract_strided_slice %34 {offsets = [0, 0], sizes = [50, 8], strides = [1, 1]} : vector<50x32xf32> to vector<50x8xf32>
    %38 = vector.extract_strided_slice %35 {offsets = [0, 0], sizes = [50, 8], strides = [1, 1]} : vector<50x32xf32> to vector<50x8xf32>
    %cst_16 = arith.constant dense<0.000000e+00> : vector<50x50xf32>
    %39 = tpu.matmul %36, %37, %cst_16 {dimension_numbers = #tpu.dot_dimension_numbers<[1], [1], [0], [0], [0, 0, 1, 0], [], []>} : vector<50x8xf32>, vector<50x8xf32>, vector<50x50xf32> -> vector<50x50xf32>
    %cst_17 = arith.constant dense<0xFF800000> : vector<50xf32>
    %40 = vector.multi_reduction <maximumf>, %39, %cst_17 [1] : vector<50x50xf32> to vector<50xf32>
    %41 = vector.shape_cast %40 : vector<50xf32> to vector<50x1xf32>
    %42 = vector.broadcast %41 : vector<50x1xf32> to vector<50x50xf32>
    %43 = arith.subf %39, %42 : vector<50x50xf32>
    %44 = math.exp %43 : vector<50x50xf32>
    %cst_18 = arith.constant dense<0.000000e+00> : vector<50xf32>
    %45 = vector.multi_reduction <add>, %44, %cst_18 [1] : vector<50x50xf32> to vector<50xf32>
    %46 = vector.shape_cast %45 : vector<50xf32> to vector<50x1xf32>
    %47 = tpu.reciprocal %46 {approx = true} : vector<50x1xf32> -> vector<50x1xf32>
    %48 = vector.broadcast %47 : vector<50x1xf32> to vector<50x50xf32>
    %49 = arith.mulf %44, %48 : vector<50x50xf32>
    %cst_19 = arith.constant dense<0.000000e+00> : vector<50x8xf32>
    %50 = tpu.matmul %49, %38, %cst_19 {dimension_numbers = #tpu.dot_dimension_numbers<[1], [0], [0], [1], [0, 0, 1, 1], [], []>} : vector<50x50xf32>, vector<50x8xf32>, vector<50x8xf32> -> vector<50x8xf32>
    %c0_20 = arith.constant 0 : index
    %c0_21 = arith.constant 0 : index
    %51 = vector.load %arg8[%c0_20, %c0_21] : memref<50x32xf32, #tpu.memory_space<vmem>>, vector<50x8xf32>
    tpu.vector_store %arg8[%c0_20, %c0_21], %50 {strides = array<i32>} : memref<50x32xf32, #tpu.memory_space<vmem>>, vector<50x8xf32>,
    %52 = vector.extract_strided_slice %33 {offsets = [0, 8], sizes = [50, 8], strides = [1, 1]} : vector<50x32xf32> to vector<50x8xf32>
    %53 = vector.extract_strided_slice %34 {offsets = [0, 8], sizes = [50, 8], strides = [1, 1]} : vector<50x32xf32> to vector<50x8xf32>
    %54 = vector.extract_strided_slice %35 {offsets = [0, 8], sizes = [50, 8], strides = [1, 1]} : vector<50x32xf32> to vector<50x8xf32>
    %cst_22 = arith.constant dense<0.000000e+00> : vector<50x50xf32>
    %55 = tpu.matmul %52, %53, %cst_22 {dimension_numbers = #tpu.dot_dimension_numbers<[1], [1], [0], [0], [0, 0, 1, 0], [], []>} : vector<50x8xf32>, vector<50x8xf32>, vector<50x50xf32> -> vector<50x50xf32>
    %cst_23 = arith.constant dense<0xFF800000> : vector<50xf32>
    %56 = vector.multi_reduction <maximumf>, %55, %cst_23 [1] : vector<50x50xf32> to vector<50xf32>
    %57 = vector.shape_cast %56 : vector<50xf32> to vector<50x1xf32>
    %58 = vector.broadcast %57 : vector<50x1xf32> to vector<50x50xf32>
    %59 = arith.subf %55, %58 : vector<50x50xf32>
    %60 = math.exp %59 : vector<50x50xf32>
    %cst_24 = arith.constant dense<0.000000e+00> : vector<50xf32>
    %61 = vector.multi_reduction <add>, %60, %cst_24 [1] : vector<50x50xf32> to vector<50xf32>
    %62 = vector.shape_cast %61 : vector<50xf32> to vector<50x1xf32>
    %63 = tpu.reciprocal %62 {approx = true} : vector<50x1xf32> -> vector<50x1xf32>
    %64 = vector.broadcast %63 : vector<50x1xf32> to vector<50x50xf32>
    %65 = arith.mulf %60, %64 : vector<50x50xf32>
    %cst_25 = arith.constant dense<0.000000e+00> : vector<50x8xf32>
    %66 = tpu.matmul %65, %54, %cst_25 {dimension_numbers = #tpu.dot_dimension_numbers<[1], [0], [0], [1], [0, 0, 1, 1], [], []>} : vector<50x50xf32>, vector<50x8xf32>, vector<50x8xf32> -> vector<50x8xf32>
    %c0_26 = arith.constant 0 : index
    %c8 = arith.constant 8 : index
    %67 = vector.load %arg8[%c0_26, %c8] : memref<50x32xf32, #tpu.memory_space<vmem>>, vector<50x8xf32>
    tpu.vector_store %arg8[%c0_26, %c8], %66 {strides = array<i32>} : memref<50x32xf32, #tpu.memory_space<vmem>>, vector<50x8xf32>,
    %68 = vector.extract_strided_slice %33 {offsets = [0, 16], sizes = [50, 8], strides = [1, 1]} : vector<50x32xf32> to vector<50x8xf32>
    %69 = vector.extract_strided_slice %34 {offsets = [0, 16], sizes = [50, 8], strides = [1, 1]} : vector<50x32xf32> to vector<50x8xf32>
    %70 = vector.extract_strided_slice %35 {offsets = [0, 16], sizes = [50, 8], strides = [1, 1]} : vector<50x32xf32> to vector<50x8xf32>
    %cst_27 = arith.constant dense<0.000000e+00> : vector<50x50xf32>
    %71 = tpu.matmul %68, %69, %cst_27 {dimension_numbers = #tpu.dot_dimension_numbers<[1], [1], [0], [0], [0, 0, 1, 0], [], []>} : vector<50x8xf32>, vector<50x8xf32>, vector<50x50xf32> -> vector<50x50xf32>
    %cst_28 = arith.constant dense<0xFF800000> : vector<50xf32>
    %72 = vector.multi_reduction <maximumf>, %71, %cst_28 [1] : vector<50x50xf32> to vector<50xf32>
    %73 = vector.shape_cast %72 : vector<50xf32> to vector<50x1xf32>
    %74 = vector.broadcast %73 : vector<50x1xf32> to vector<50x50xf32>
    %75 = arith.subf %71, %74 : vector<50x50xf32>
    %76 = math.exp %75 : vector<50x50xf32>
    %cst_29 = arith.constant dense<0.000000e+00> : vector<50xf32>
    %77 = vector.multi_reduction <add>, %76, %cst_29 [1] : vector<50x50xf32> to vector<50xf32>
    %78 = vector.shape_cast %77 : vector<50xf32> to vector<50x1xf32>
    %79 = tpu.reciprocal %78 {approx = true} : vector<50x1xf32> -> vector<50x1xf32>
    %80 = vector.broadcast %79 : vector<50x1xf32> to vector<50x50xf32>
    %81 = arith.mulf %76, %80 : vector<50x50xf32>
    %cst_30 = arith.constant dense<0.000000e+00> : vector<50x8xf32>
    %82 = tpu.matmul %81, %70, %cst_30 {dimension_numbers = #tpu.dot_dimension_numbers<[1], [0], [0], [1], [0, 0, 1, 1], [], []>} : vector<50x50xf32>, vector<50x8xf32>, vector<50x8xf32> -> vector<50x8xf32>
    %c0_31 = arith.constant 0 : index
    %c16 = arith.constant 16 : index
    %83 = vector.load %arg8[%c0_31, %c16] : memref<50x32xf32, #tpu.memory_space<vmem>>, vector<50x8xf32>
    tpu.vector_store %arg8[%c0_31, %c16], %82 {strides = array<i32>} : memref<50x32xf32, #tpu.memory_space<vmem>>, vector<50x8xf32>,
    %84 = vector.extract_strided_slice %33 {offsets = [0, 24], sizes = [50, 8], strides = [1, 1]} : vector<50x32xf32> to vector<50x8xf32>
    %85 = vector.extract_strided_slice %34 {offsets = [0, 24], sizes = [50, 8], strides = [1, 1]} : vector<50x32xf32> to vector<50x8xf32>
    %86 = vector.extract_strided_slice %35 {offsets = [0, 24], sizes = [50, 8], strides = [1, 1]} : vector<50x32xf32> to vector<50x8xf32>
    %cst_32 = arith.constant dense<0.000000e+00> : vector<50x50xf32>
    %87 = tpu.matmul %84, %85, %cst_32 {dimension_numbers = #tpu.dot_dimension_numbers<[1], [1], [0], [0], [0, 0, 1, 0], [], []>} : vector<50x8xf32>, vector<50x8xf32>, vector<50x50xf32> -> vector<50x50xf32>
    %cst_33 = arith.constant dense<0xFF800000> : vector<50xf32>
    %88 = vector.multi_reduction <maximumf>, %87, %cst_33 [1] : vector<50x50xf32> to vector<50xf32>
    %89 = vector.shape_cast %88 : vector<50xf32> to vector<50x1xf32>
    %90 = vector.broadcast %89 : vector<50x1xf32> to vector<50x50xf32>
    %91 = arith.subf %87, %90 : vector<50x50xf32>
    %92 = math.exp %91 : vector<50x50xf32>
    %cst_34 = arith.constant dense<0.000000e+00> : vector<50xf32>
    %93 = vector.multi_reduction <add>, %92, %cst_34 [1] : vector<50x50xf32> to vector<50xf32>
    %94 = vector.shape_cast %93 : vector<50xf32> to vector<50x1xf32>
    %95 = tpu.reciprocal %94 {approx = true} : vector<50x1xf32> -> vector<50x1xf32>
    %96 = vector.broadcast %95 : vector<50x1xf32> to vector<50x50xf32>
    %97 = arith.mulf %92, %96 : vector<50x50xf32>
    %cst_35 = arith.constant dense<0.000000e+00> : vector<50x8xf32>
    %98 = tpu.matmul %97, %86, %cst_35 {dimension_numbers = #tpu.dot_dimension_numbers<[1], [0], [0], [1], [0, 0, 1, 1], [], []>} : vector<50x50xf32>, vector<50x8xf32>, vector<50x8xf32> -> vector<50x8xf32>
    %c0_36 = arith.constant 0 : index
    %c24 = arith.constant 24 : index
    %99 = vector.load %arg8[%c0_36, %c24] : memref<50x32xf32, #tpu.memory_space<vmem>>, vector<50x8xf32>
    tpu.vector_store %arg8[%c0_36, %c24], %98 {strides = array<i32>} : memref<50x32xf32, #tpu.memory_space<vmem>>, vector<50x8xf32>,
    %c0_37 = arith.constant 0 : index
    %c0_38 = arith.constant 0 : index
    %100 = vector.load %arg8[%c0_37, %c0_38] : memref<50x32xf32, #tpu.memory_space<vmem>>, vector<50x32xf32>
    %101 = arith.addf %1, %100 : vector<50x32xf32>
    %cst_39 = arith.constant dense<0.000000e+00> : vector<50xf32>
    %102 = vector.multi_reduction <add>, %101, %cst_39 [1] : vector<50x32xf32> to vector<50xf32>
    %103 = vector.shape_cast %102 : vector<50xf32> to vector<50x1xf32>
    %cst_40 = arith.constant 3.200000e+01 : f32
    %104 = vector.broadcast %cst_40 : f32 to vector<50x1xf32>
    %105 = arith.divf %103, %104 : vector<50x1xf32>
    %106 = vector.broadcast %105 : vector<50x1xf32> to vector<50x32xf32>
    %107 = arith.subf %101, %106 : vector<50x32xf32>
    %108 = arith.mulf %107, %107 : vector<50x32xf32>
    %cst_41 = arith.constant dense<0.000000e+00> : vector<50xf32>
    %109 = vector.multi_reduction <add>, %108, %cst_41 [1] : vector<50x32xf32> to vector<50xf32>
    %110 = vector.shape_cast %109 : vector<50xf32> to vector<50x1xf32>
    %cst_42 = arith.constant 3.200000e+01 : f32
    %111 = vector.broadcast %cst_42 : f32 to vector<50x1xf32>
    %112 = arith.divf %110, %111 : vector<50x1xf32>
    %113 = vector.broadcast %105 : vector<50x1xf32> to vector<50x32xf32>
    %114 = arith.subf %101, %113 : vector<50x32xf32>
    %cst_43 = arith.constant 9.99999974E-6 : f32
    %115 = vector.broadcast %cst_43 : f32 to vector<50x1xf32>
    %116 = arith.addf %112, %115 : vector<50x1xf32>
    %117 = math.rsqrt %116 : vector<50x1xf32>
    %118 = vector.broadcast %117 : vector<50x1xf32> to vector<50x32xf32>
    %119 = arith.mulf %114, %118 : vector<50x32xf32>
    %120 = vector.broadcast %4 : vector<1x32xf32> to vector<50x32xf32>
    %121 = arith.mulf %119, %120 : vector<50x32xf32>
    %122 = vector.broadcast %5 : vector<1x32xf32> to vector<50x32xf32>
    %123 = arith.addf %121, %122 : vector<50x32xf32>
    %c0_44 = arith.constant 0 : index
    %c0_45 = arith.constant 0 : index
    %124 = vector.load %arg5[%c0_44, %c0_45] : memref<32x32xf32, #tpu.memory_space<vmem>>, vector<32x32xf32>
    %cst_46 = arith.constant dense<0.000000e+00> : vector<50x32xf32>
    %125 = tpu.matmul %123, %124, %cst_46 {dimension_numbers = #tpu.dot_dimension_numbers<[1], [0], [0], [1], [0, 0, 1, 1], [], []>} : vector<50x32xf32>, vector<32x32xf32>, vector<50x32xf32> -> vector<50x32xf32>
    %c0_47 = arith.constant 0 : index
    %c0_48 = arith.constant 0 : index
    %126 = vector.load %arg6[%c0_47, %c0_48] : memref<1x32xf32, #tpu.memory_space<vmem>>, vector<1x32xf32>
    %127 = vector.broadcast %126 : vector<1x32xf32> to vector<50x32xf32>
    %128 = arith.addf %125, %127 : vector<50x32xf32>
    %129 = arith.addf %101, %128 : vector<50x32xf32>
    %130 = vector.shape_cast %129 : vector<50x32xf32> to vector<1x50x32xf32>
    %c0_49 = arith.constant 0 : index
    %c0_50 = arith.constant 0 : index
    %c0_51 = arith.constant 0 : index
    %131 = vector.load %arg7[%c0_49, %c0_50, %c0_51] : memref<1x50x32xf32, #tpu.memory_space<vmem>>, vector<1x50x32xf32>
    tpu.vector_store %arg7[%c0_49, %c0_50, %c0_51], %130 {strides = array<i32>} : memref<1x50x32xf32, #tpu.memory_space<vmem>>, vector<1x50x32xf32>,
    return
  }
  func.func @transform_0(%arg0: i32) -> (i32, i32, i32) {
    %c0_i32 = arith.constant 0 : i32
    %c0_i32_0 = arith.constant 0 : i32
    %c0_i32_1 = arith.constant 0 : i32
    return %arg0, %c0_i32, %c0_i32_0 : i32, i32, i32
  }
  func.func @transform_1(%arg0: i32) -> (i32, i32) {
    %c0_i32 = arith.constant 0 : i32
    %c0_i32_0 = arith.constant 0 : i32
    %c0_i32_1 = arith.constant 0 : i32
    return %c0_i32, %c0_i32_0 : i32, i32
  }
  func.func @transform_2(%arg0: i32) -> (i32, i32) {
    %c0_i32 = arith.constant 0 : i32
    %c0_i32_0 = arith.constant 0 : i32
    %c0_i32_1 = arith.constant 0 : i32
    return %c0_i32, %c0_i32_0 : i32, i32
  }
  func.func @transform_3(%arg0: i32) -> (i32, i32) {
    %c0_i32 = arith.constant 0 : i32
    %c0_i32_0 = arith.constant 0 : i32
    %c0_i32_1 = arith.constant 0 : i32
    return %c0_i32, %c0_i32_0 : i32, i32
  }
  func.func @transform_4(%arg0: i32) -> (i32, i32) {
    %c0_i32 = arith.constant 0 : i32
    %c0_i32_0 = arith.constant 0 : i32
    %c0_i32_1 = arith.constant 0 : i32
    return %c0_i32, %c0_i32_0 : i32, i32
  }
  func.func @transform_5(%arg0: i32) -> (i32, i32) {
    %c0_i32 = arith.constant 0 : i32
    %c0_i32_0 = arith.constant 0 : i32
    %c0_i32_1 = arith.constant 0 : i32
    return %c0_i32, %c0_i32_0 : i32, i32
  }
  func.func @transform_6(%arg0: i32) -> (i32, i32, i32) {
    %c0_i32 = arith.constant 0 : i32
    %c0_i32_0 = arith.constant 0 : i32
    %c0_i32_1 = arith.constant 0 : i32
    return %arg0, %c0_i32, %c0_i32_0 : i32, i32, i32
  }
}

</mosaic_0001>

<bundles_post_ra>
// kernel: tpu_custom_call.1
= control target key start
LH: loop header
LB: loop body
LE: loop exit
PB: predicated region body
PF: predicated region fallthrough
CT: control target
= control target key end

     0   :  { %s3287_s21 = smov 0   ;;  %s4330_s0 = inlined_call_operand.vmem [shape: f32[2,50,32], index: 0, kind: input, shape index: {}]   ;;  %s4331_s1 = inlined_call_operand.vmem [shape: f32[4,32], index: 1, kind: input, shape index: {}]   ;;  %s4332_s2 = inlined_call_operand.vmem [shape: f32[32,96], index: 2, kind: input, shape index: {}]   ;;  %s4333_s3 = inlined_call_operand.vmem [shape: f32[1,96], index: 3, kind: input, shape index: {}]   ;;  %s4334_s4 = inlined_call_operand.vmem [shape: f32[32,32], index: 4, kind: input, shape index: {}]   ;;  %s4335_s5 = inlined_call_operand.vmem [shape: f32[1,32], index: 5, kind: input, shape index: {}]   ;;  %s4336_s6 = inlined_call_operand.vmem [shape: f32[2,50,32], index: 6, kind: output, shape index: {}]  }
   0x1 LB: > { %s2459_s22 = sadd.s32 4294967295, %s3234_s21   ;;  %p2463_p0 = scmp.ge.s32.totalorder %s3234_s21, 1  ;;  %s3234_s21 = sphi %s3287_s21, %s16_s21  }
   0x2   : > { %p212_p1 = scmp.lt.s32.totalorder %s3234_s21, 3 }
   0x4   : > { %p213_p2 = pnand %p2463_p0, %p212_p1 }
   0x6   : > { %216 = sbr.rel (%p213_p2) target bundleno = 2242 (0x8c2), region = 44 }
   0xb   : > { %p242_p3 = scmp.lt.s32.totalorder %s2459_s22, 1  ;;  %vm263_vm0 = vcmask 261120   ;;  %vm282_vm1 = vcmask 254976   ;;  %v4337_v49 = vmov 0.0   ;;  %v382_v50 = vld [vmem:[%s4332_s2 + $0x18] sm:$0xff]  ;;  %v381_v51 = vld [vmem:[%s4332_s2 + $0x10] sm:$0xff] }
   0xc   : > { %2710 = vmatprep.subr.mxu0 %v4337_v49  ;;  %2739 = vmatprep.subr.mxu1 %v4337_v49  ;;  %vm3237_vm2 = vmmov 0   ;;  %v380_v52 = vld [vmem:[%s4332_s2 + $0x8] sm:$0xff]  ;;  %v379_v53 = vld [vmem:[%s4332_s2] sm:$0xff]  ;;  %s3238_s17 = smov 96   ;;  %s3239_s18 = smov 88   ;;  %vm532_vm3 = vcmask 64512  }
   0xd   : > { %s4343_s22 = smov (!%p242_p3, %s2459_s22), 1  ;;  %2711 = vmatpush3.msra.mxu0 %v382_v50  ;;  %2718 = vmatprep.mubr.msk.f32.mxu0 %vm3237_vm2, %v4337_v49  ;;  %s3240_s19 = smov 120   ;;  %vm781_vm4 = vcmask 1041408   ;;  %vm661_vm5 = vcmask 408576   ;;  %vm680_vm6 = vcmask 402432   ;;  %vm890_vm7 = vcmask 58368  }
   0xe   : > { %s3056_s23 = smul.u32 56, %s4343_s22  ;;  %2712 = vmatprep.subr.mxu0 %v4337_v49  ;;  %2753 = vmatprep.mubr.msk.f32.mxu1 %vm3237_vm2, %v4337_v49  ;;  %s3241_s20 = smov 80   ;;  %vm1296_vm8 = vcmask 130112   ;;  %vm1709_vm9 = vcmask 195712   ;;  %vm2122_vm10 = vcmask 261312   ;;  %vm1303_vm11 = vcmask 123968  }
   0xf   : > { %2713 = vmatpush3.msra.mxu0 %v381_v51  ;;  %s3242_s24 = smov 112   ;;  %s3243_s25 = smov 72   ;;  %vm1716_vm12 = vcmask 189568   ;;  %vm2129_vm13 = vcmask 255168  }
  0x10   : > { %s3303_s26 = scalar_lea.vmem %s4330_s0, %s3056_s23  ;;  %2714 = vmatprep.subr.mxu0 %v4337_v49  ;;  %s3244_s27 = smov 104  }
  0x11   : > { %v252_v0 = vld [vmem:[%s3303_s26] sm:$0xff]  ;;  %v254_v1 = vld [vmem:[%s3303_s26 + $0x10] sm:$0xff]  ;;  %v253_v2 = vld [vmem:[%s3303_s26 + $0x8] sm:$0xff]  ;;  %2715 = vmatpush3.msra.mxu0 %v380_v52  ;;  %s3245_s28 = smov 64   ;;  %s3246_s29 = smov 56  }
  0x12   : > { %v264_v3 = vsel %vm263_vm0, %v252_v0, 0.0  ;;  %v270_v4 = vsel %vm263_vm0, %v254_v1, 0.0  ;;  %v255_v5 = vld [vmem:[%s3303_s26 + $0x18] sm:$0xff]  ;;  %v267_v6 = vsel %vm263_vm0, %v253_v2, 0.0  ;;  %v256_v8 = vld [vmem:[%s3303_s26 + $0x20] sm:$0xff]  ;;  %v257_v9 = vld [vmem:[%s3303_s26 + $0x28] sm:$0xff]  ;;  %2716 = vmatprep.subr.mxu0 %v4337_v49 }
  0x13   : > { %265 = vadd.xlane.f32.xlu0 %v264_v3  ;;  %271 = vadd.xlane.f32.xlu1 %v270_v4  ;;  %v273_v7 = vsel %vm263_vm0, %v255_v5, 0.0  ;;  %v276_v10 = vsel %vm263_vm0, %v256_v8, 0.0  ;;  %v279_v11 = vsel %vm263_vm0, %v257_v9, 0.0  ;;  %v258_v12 = vld [vmem:[%s3303_s26 + $0x30] sm:$0x3]  ;;  %s3247_s30 = smov 48  }
  0x14   : > { %v283_v13 = vsel %vm282_vm1, %v258_v12, 0.0  ;;  %2717 = vmatpush3.msra.mxu0 %v379_v53  ;;  %v2468_v52 = vld [vmem:[%s4333_s3] ss:$0 sm:$0xff]  ;;  %s3248_s7 = smov 40   ;;  %s3249_s8 = smov 8  }
  0x15   : > { %2774 = vmatprep.subr.mxu0 %v4337_v49  ;;  %s3250_s9 = smov 16   ;;  %s3251_s10 = smov 24  }
  0x17   : > { %268 = vadd.xlane.f32.xlu0 %v267_v6  ;;  %274 = vadd.xlane.f32.xlu1 %v273_v7 }
  0x1b   : > { %277 = vadd.xlane.f32.xlu0 %v276_v10  ;;  %280 = vadd.xlane.f32.xlu1 %v279_v11  ;;  %v2466_v11 = vld [vmem:[%s4331_s1] ss:$0 sm:$0xff] }
  0x1f   : > { %284 = vadd.xlane.f32.xlu0 %v283_v13 }
  0x9c   : > { %v266_v14 = vpop.xlane.xlu0 %265  ;;  %v272_v15 = vpop.xlane.xlu1 %271 }
  0x9d   : > { %v287_v16 = vmul.f32 0.03125, %v266_v14  ;;  %v289_v17 = vmul.f32 0.03125, %v272_v15  ;;  %v2467_v14 = vld [vmem:[%s4331_s1 + $0x1] ss:$0 sm:$0xff] }
  0x9f   : > { %v3319_v18 = vsub.f32 %v252_v0, %v287_v16  ;;  %v3321_v19 = vsub.f32 %v254_v1, %v289_v17 }
  0xa0   : > { %v269_v20 = vpop.xlane.xlu0 %268  ;;  %v275_v21 = vpop.xlane.xlu1 %274 }
  0xa1   : > { %v288_v22 = vmul.f32 0.03125, %v269_v20  ;;  %v290_v23 = vmul.f32 0.03125, %v275_v21  ;;  %v301_v24 = vmul.f32 %v3319_v18, %v3319_v18  ;;  %v303_v25 = vmul.f32 %v3321_v19, %v3321_v19 }
  0xa3   : > { %v3327_v26 = vsub.f32 %v253_v2, %v288_v22  ;;  %v3329_v27 = vsub.f32 %v255_v5, %v290_v23  ;;  %v308_v28 = vsel %vm263_vm0, %v301_v24, 0.0  ;;  %v314_v31 = vsel %vm263_vm0, %v303_v25, 0.0 }
  0xa4   : > { %309 = vadd.xlane.f32.xlu1 %v308_v28  ;;  %v278_v29 = vpop.xlane.xlu0 %277  ;;  %v281_v30 = vpop.xlane.xlu1 %280 }
  0xa5   : > { %v291_v32 = vmul.f32 0.03125, %v278_v29  ;;  %v292_v33 = vmul.f32 0.03125, %v281_v30  ;;  %v302_v34 = vmul.f32 %v3327_v26, %v3327_v26  ;;  %v304_v35 = vmul.f32 %v3329_v27, %v3329_v27 }
  0xa7   : > { %v3337_v36 = vsub.f32 %v256_v8, %v291_v32  ;;  %v3339_v37 = vsub.f32 %v257_v9, %v292_v33  ;;  %v311_v38 = vsel %vm263_vm0, %v302_v34, 0.0  ;;  %v317_v41 = vsel %vm263_vm0, %v304_v35, 0.0 }
  0xa8   : > { %315 = vadd.xlane.f32.xlu1 %v314_v31  ;;  %312 = vadd.xlane.f32.xlu0 %v311_v38  ;;  %v285_v39 = vpop.xlane.xlu0 %284 }
  0xa9   : > { %v293_v40 = vmul.f32 0.03125, %v285_v39  ;;  %v305_v42 = vmul.f32 %v3337_v36, %v3337_v36  ;;  %v306_v43 = vmul.f32 %v3339_v37, %v3339_v37 }
  0xab   : > { %v3347_v44 = vsub.f32 %v258_v12, %v293_v40  ;;  %v320_v45 = vsel %vm263_vm0, %v305_v42, 0.0  ;;  %v323_v46 = vsel %vm263_vm0, %v306_v43, 0.0 }
  0xac   : > { %318 = vadd.xlane.f32.xlu0 %v317_v41  ;;  %321 = vadd.xlane.f32.xlu1 %v320_v45 }
  0xad   : > { %v307_v47 = vmul.f32 %v3347_v44, %v3347_v44 }
  0xaf   : > { %v326_v48 = vsel %vm282_vm1, %v307_v47, 0.0 }
  0xb0   : > { %324 = vadd.xlane.f32.xlu0 %v323_v46  ;;  %327 = vadd.xlane.f32.xlu1 %v326_v48 }
 0x12d   : > { %v310_v54 = vpop.xlane.xlu1 %309 }
 0x12e   : > { %v329_v55 = vmul.f32 0.03125, %v310_v54 }
 0x130   : > { %v336_v56 = vadd.f32 1e-05, %v329_v55 }
 0x131   : > { %v316_v57 = vpop.xlane.xlu1 %315  ;;  %v313_v58 = vpop.xlane.xlu0 %312 }
 0x132   : > { %3081 = vrsqrt.f32 %v336_v56  ;;  %v331_v59 = vmul.f32 0.03125, %v316_v57  ;;  %v330_v60 = vmul.f32 0.03125, %v313_v58 }
 0x134   : > { %v338_v61 = vadd.f32 1e-05, %v331_v59  ;;  %v337_v62 = vadd.f32 1e-05, %v330_v60 }
 0x135   : > { %v322_v63 = vpop.xlane.xlu1 %321  ;;  %v319_v0 = vpop.xlane.xlu0 %318 }
 0x136   : > { %3083 = vrsqrt.f32 %v338_v61  ;;  %v333_v1 = vmul.f32 0.03125, %v322_v63  ;;  %v332_v2 = vmul.f32 0.03125, %v319_v0 }
 0x137   : > { %3085 = vrsqrt.f32 %v337_v62 }
 0x138   : > { %v339_v3 = vadd.f32 1e-05, %v332_v2  ;;  %v340_v4 = vadd.f32 1e-05, %v333_v1 }
 0x139   : > { %v325_v5 = vpop.xlane.xlu0 %324  ;;  %v328_v6 = vpop.xlane.xlu1 %327 }
 0x13a   : > { %v334_v7 = vmul.f32 0.03125, %v325_v5  ;;  %3087 = vrsqrt.f32 %v339_v3  ;;  %v335_v8 = vmul.f32 0.03125, %v328_v6 }
 0x13b   : > { %3089 = vrsqrt.f32 %v340_v4 }
 0x13c   : > { %v341_v9 = vadd.f32 1e-05, %v334_v7  ;;  %v342_v13 = vadd.f32 1e-05, %v335_v8 }
 0x13e   : > { %3091 = vrsqrt.f32 %v341_v9 }
 0x13f   : > { %v3082_v10 = vpop.eup %3081  ;;  %3093 = vrsqrt.f32 %v342_v13 }
 0x140   : > { %v350_v12 = vmul.f32 %v3082_v10, %v3319_v18 }
 0x142   : > { %v361_v15 = vmul.f32 %v2466_v11, %v350_v12 }
 0x143   : > { %v3084_v16 = vpop.eup %3083 }
 0x144   : > { %v3086_v17 = vpop.eup %3085  ;;  %v372_v20 = vadd.f32 %v2467_v14, %v361_v15  ;;  %v352_v22 = vmul.f32 %v3084_v16, %v3321_v19 }
 0x145   : > { %v351_v21 = vmul.f32 %v3086_v17, %v3327_v26 }
 0x146   : > { %2719 = vmatmul.mubr.msk.f32.vlgmr.msra.gmra.mxu0 %vm263_vm0, %v372_v20  ;;  %v363_v25 = vmul.f32 %v2466_v11, %v352_v22 }
 0x147   : > { %2721 = vmatprep.mubr.msk.f32.mxu0 %vm3237_vm2, %v4337_v49  ;;  %v362_v18 = vmul.f32 %v2466_v11, %v351_v21  ;;  %v3088_v23 = vpop.eup %3087 }
 0x148   : > { %v353_v28 = vmul.f32 %v3088_v23, %v3329_v27  ;;  %v3090_v29 = vpop.eup %3089  ;;  %v374_v26 = vadd.f32 %v2467_v14, %v363_v25 }
 0x149   : > { %v373_v24 = vadd.f32 %v2467_v14, %v362_v18  ;;  %v354_v19 = vmul.f32 %v3090_v29, %v3337_v36 }
 0x14a   : > { %v364_v30 = vmul.f32 %v2466_v11, %v353_v28 }
 0x14b   : > { %2722 = vmatmul.mubr.msk.f32.gmra.mxu0 %vm263_vm0, %v373_v24  ;;  %v3092_v31 = vpop.eup %3091  ;;  %v365_v33 = vmul.f32 %v2466_v11, %v354_v19 }
 0x14c   : > { %2724 = vmatprep.mubr.msk.f32.mxu0 %vm3237_vm2, %v4337_v49  ;;  %v375_v32 = vadd.f32 %v2467_v14, %v364_v30  ;;  %v355_v27 = vmul.f32 %v3092_v31, %v3339_v37  ;;  %v3094_v34 = vpop.eup %3093 }
 0x14d   : > { %v376_v35 = vadd.f32 %v2467_v14, %v365_v33  ;;  %v356_v36 = vmul.f32 %v3094_v34, %v3347_v44 }
 0x14e   : > { %v366_v38 = vmul.f32 %v2466_v11, %v355_v27 }
 0x14f   : > { %2725 = vmatmul.mubr.msk.f32.gmra.mxu0 %vm263_vm0, %v374_v26  ;;  %v367_v40 = vmul.f32 %v2466_v11, %v356_v36 }
 0x150   : > { %2727 = vmatprep.mubr.msk.f32.mxu0 %vm3237_vm2, %v4337_v49  ;;  %v377_v39 = vadd.f32 %v2467_v14, %v366_v38 }
 0x151   : > { %v378_v37 = vadd.f32 %v2467_v14, %v367_v40 }
 0x153   : > { %2728 = vmatmul.mubr.msk.f32.gmra.mxu0 %vm263_vm0, %v375_v32 }
 0x154   : > { %2730 = vmatprep.mubr.msk.f32.mxu0 %vm3237_vm2, %v4337_v49 }
 0x157   : > { %2731 = vmatmul.mubr.msk.f32.gmra.mxu0 %vm263_vm0, %v376_v35 }
 0x158   : > { %2733 = vmatprep.mubr.msk.f32.mxu0 %vm3237_vm2, %v4337_v49 }
 0x15b   : > { %2734 = vmatmul.mubr.msk.f32.gmra.mxu0 %vm263_vm0, %v377_v39 }
 0x15c   : > { %2736 = vmatprep.mubr.msk.f32.mxu0 %vm3237_vm2, %v4337_v49 }
 0x15f   : > { %2737 = vmatmul.mubr.msk.f32.gmra.mxu0 %vm263_vm0, %v378_v37 }
 0x160   : > { %2788 = vmatprep.mubr.msk.f32.mxu0 %vm3237_vm2, %v4337_v49 }
 0x206   : > { %v477_v41 = vpop.f32.mrf.mxu0 }
 0x207   : > { %v3428_v62 = vadd.f32 %v2468_v52, %v477_v41 }
 0x208   : > { %v2720_v42 = vpop.f32.mrf.mxu0 }
 0x20b   : > { %v482_v43 = vpop.f32.mrf.mxu0 }
 0x20c   : > { %v3430_v63 = vadd.f32 %v2468_v52, %v482_v43 }
 0x20d   : > { %v2723_v44 = vpop.f32.mrf.mxu0 }
 0x20f   : > { %v487_v45 = vpop.f32.mrf.mxu0 }
 0x210   : > { %v3422_v60 = vadd.f32 %v2468_v52, %v487_v45 }
 0x211   : > { %v2726_v46 = vpop.f32.mrf.mxu0 }
 0x213   : > { %v492_v47 = vpop.f32.mrf.mxu0 }
 0x214   : > { %v3424_v61 = vadd.f32 %v2468_v52, %v492_v47 }
 0x215   : > { %v2729_v48 = vpop.f32.mrf.mxu0 }
 0x217   : > { %v497_v50 = vpop.f32.mrf.mxu0 }
 0x218   : > { %v3416_v57 = vadd.f32 %v2468_v52, %v497_v50 }
 0x219   : > { %v2732_v51 = vpop.f32.mrf.mxu0 }
 0x21b   : > { %v502_v53 = vpop.f32.mrf.mxu0 }
 0x21c   : > { %v3413_v54 = vadd.f32 %v2468_v52, %v502_v53 }
 0x21d   : > { %v2735_v55 = vpop.f32.mrf.mxu0 }
 0x21e   : > { %528 = vrot.lane.b32.xlu1 %v3413_v54, %s3238_s17 }
 0x21f   : > { %v507_v56 = vpop.f32.mrf.mxu0 }
 0x220   : > { %v3418_v58 = vadd.f32 %v2468_v52, %v507_v56 }
 0x221   : > { %v2738_v59 = vpop.f32.mrf.mxu0 }
 0x222   : > { %526 = vrot.lane.b32.xlu1 %v3416_v57, %s3238_s17  ;;  %530 = vrot.lane.b32.xlu0 %v3418_v58, %s3238_s17 }
 0x226   : > { %524 = vrot.lane.b32.xlu1 %v3424_v61, %s3238_s17  ;;  %522 = vrot.lane.b32.xlu0 %v3422_v60, %s3238_s17 }
 0x22a   : > { %520 = vrot.lane.b32.xlu1 %v3430_v63, %s3238_s17  ;;  %518 = vrot.lane.b32.xlu0 %v3428_v62, %s3238_s17 }
 0x22e   : > { %918 = vrot.lane.b32.xlu1 %v3418_v58, %s3239_s18  ;;  %916 = vrot.lane.b32.xlu0 %v3413_v54, %s3239_s18 }
 0x232   : > { %914 = vrot.lane.b32.xlu1 %v3416_v57, %s3239_s18  ;;  %912 = vrot.lane.b32.xlu0 %v3424_v61, %s3239_s18 }
 0x236   : > { %910 = vrot.lane.b32.xlu1 %v3422_v60, %s3239_s18  ;;  %908 = vrot.lane.b32.xlu0 %v3430_v63, %s3239_s18 }
 0x23a   : > { %906 = vrot.lane.b32.xlu1 %v3428_v62, %s3239_s18  ;;  %892 = vrot.lane.b32.xlu0 %v3428_v62, %s3240_s19 }
 0x23e   : > { %1331 = vrot.lane.b32.xlu1 %v3418_v58, %s3241_s20  ;;  %894 = vrot.lane.b32.xlu0 %v3430_v63, %s3240_s19 }
 0x242   : > { %1329 = vrot.lane.b32.xlu1 %v3413_v54, %s3241_s20  ;;  %896 = vrot.lane.b32.xlu0 %v3422_v60, %s3240_s19 }
 0x246   : > { %1327 = vrot.lane.b32.xlu1 %v3416_v57, %s3241_s20  ;;  %898 = vrot.lane.b32.xlu0 %v3424_v61, %s3240_s19 }
 0x24a   : > { %1325 = vrot.lane.b32.xlu1 %v3424_v61, %s3241_s20  ;;  %900 = vrot.lane.b32.xlu0 %v3416_v57, %s3240_s19 }
 0x24e   : > { %1323 = vrot.lane.b32.xlu1 %v3422_v60, %s3241_s20  ;;  %902 = vrot.lane.b32.xlu0 %v3413_v54, %s3240_s19 }
 0x252   : > { %1321 = vrot.lane.b32.xlu1 %v3430_v63, %s3241_s20  ;;  %904 = vrot.lane.b32.xlu0 %v3418_v58, %s3240_s19 }
 0x256   : > { %1319 = vrot.lane.b32.xlu1 %v3428_v62, %s3241_s20  ;;  %1305 = vrot.lane.b32.xlu0 %v3428_v62, %s3242_s24 }
 0x25a   : > { %1744 = vrot.lane.b32.xlu1 %v3418_v58, %s3243_s25  ;;  %1307 = vrot.lane.b32.xlu0 %v3430_v63, %s3242_s24 }
 0x25e   : > { %1742 = vrot.lane.b32.xlu1 %v3413_v54, %s3243_s25  ;;  %1309 = vrot.lane.b32.xlu0 %v3422_v60, %s3242_s24 }
 0x262   : > { %1740 = vrot.lane.b32.xlu1 %v3416_v57, %s3243_s25  ;;  %1311 = vrot.lane.b32.xlu0 %v3424_v61, %s3242_s24 }
 0x266   : > { %1738 = vrot.lane.b32.xlu1 %v3424_v61, %s3243_s25  ;;  %1313 = vrot.lane.b32.xlu0 %v3416_v57, %s3242_s24 }
 0x26a   : > { %1736 = vrot.lane.b32.xlu1 %v3422_v60, %s3243_s25  ;;  %1315 = vrot.lane.b32.xlu0 %v3413_v54, %s3242_s24 }
 0x26e   : > { %1734 = vrot.lane.b32.xlu1 %v3430_v63, %s3243_s25  ;;  %1317 = vrot.lane.b32.xlu0 %v3418_v58, %s3242_s24 }
 0x272   : > { %1732 = vrot.lane.b32.xlu1 %v3428_v62, %s3243_s25  ;;  %1718 = vrot.lane.b32.xlu0 %v3428_v62, %s3244_s27 }
 0x276   : > { %1720 = vrot.lane.b32.xlu1 %v3430_v63, %s3244_s27  ;;  %1722 = vrot.lane.b32.xlu0 %v3422_v60, %s3244_s27 }
 0x27a   : > { %1724 = vrot.lane.b32.xlu1 %v3424_v61, %s3244_s27  ;;  %1726 = vrot.lane.b32.xlu0 %v3416_v57, %s3244_s27 }
 0x27e   : > { %1728 = vrot.lane.b32.xlu1 %v3413_v54, %s3244_s27  ;;  %1730 = vrot.lane.b32.xlu0 %v3418_v58, %s3244_s27 }
 0x282   : > { %748 = vrot.lane.b32.xlu1 %v3416_v57, %s3245_s28  ;;  %750 = vrot.lane.b32.xlu0 %v3413_v54, %s3245_s28 }
 0x286   : > { %746 = vrot.lane.b32.xlu1 %v3424_v61, %s3245_s28  ;;  %744 = vrot.lane.b32.xlu0 %v3422_v60, %s3245_s28 }
 0x28a   : > { %1133 = vrot.lane.b32.xlu1 %v3416_v57, %s3246_s29  ;;  %742 = vrot.lane.b32.xlu0 %v3430_v63, %s3245_s28 }
 0x28e   : > { %1127 = vrot.lane.b32.xlu1 %v3430_v63, %s3246_s29  ;;  %740 = vrot.lane.b32.xlu0 %v3428_v62, %s3245_s28 }
 0x290   : > { %v529_v0 = vpop.permute.xlu1 %528 }
 0x292   : > { %1546 = vrot.lane.b32.xlu1 %v3416_v57, %s3247_s30  ;;  %1135 = vrot.lane.b32.xlu0 %v3413_v54, %s3246_s29 }
 0x294   : > { %v527_v1 = vpop.permute.xlu1 %526  ;;  %v531_v2 = vpop.permute.xlu0 %530 }
 0x295   : > { %2740 = vmatpush3.xpose.msk.msra.mxu1 %vm532_vm3, %v531_v2 }
 0x296   : > { %1540 = vrot.lane.b32.xlu1 %v3430_v63, %s3247_s30  ;;  %1131 = vrot.lane.b32.xlu0 %v3424_v61, %s3246_s29 }
 0x297   : > { %2741 = vmatprep.subr.mxu1 %v4337_v49 }
 0x298   : > { %v525_v3 = vpop.permute.xlu1 %524  ;;  %v523_v4 = vpop.permute.xlu0 %522 }
 0x299   : > { %2742 = vmatpush3.xpose.msk.msra.mxu1 %vm532_vm3, %v529_v0 }
 0x29a   : > { %752 = vrot.lane.b32.xlu1 %v3418_v58, %s3245_s28  ;;  %1129 = vrot.lane.b32.xlu0 %v3422_v60, %s3246_s29 }
 0x29b   : > { %2743 = vmatprep.subr.mxu1 %v4337_v49 }
 0x29c   : > { %v521_v5 = vpop.permute.xlu1 %520  ;;  %v519_v6 = vpop.permute.xlu0 %518 }
 0x29d   : > { %2744 = vmatpush3.xpose.msk.msra.mxu1 %vm532_vm3, %v527_v1 }
 0x29e   : > { %1137 = vrot.lane.b32.xlu1 %v3418_v58, %s3246_s29  ;;  %1125 = vrot.lane.b32.xlu0 %v3428_v62, %s3246_s29 }
 0x29f   : > { %2745 = vmatprep.subr.mxu1 %v4337_v49 }
 0x2a0   : > { %v919_v7 = vpop.permute.xlu1 %918  ;;  %v917_v8 = vpop.permute.xlu0 %916 }
 0x2a1   : > { %2746 = vmatpush3.xpose.msk.msra.mxu1 %vm532_vm3, %v525_v3 }
 0x2a2   : > { %1550 = vrot.lane.b32.xlu1 %v3418_v58, %s3247_s30  ;;  %1548 = vrot.lane.b32.xlu0 %v3413_v54, %s3247_s30 }
 0x2a3   : > { %2747 = vmatprep.subr.mxu1 %v4337_v49 }
 0x2a4   : > { %v915_v9 = vpop.permute.xlu1 %914  ;;  %v913_v10 = vpop.permute.xlu0 %912 }
 0x2a5   : > { %2748 = vmatpush3.xpose.msk.msra.mxu1 %vm532_vm3, %v523_v4 }
 0x2a6   : > { %1544 = vrot.lane.b32.xlu0 %v3424_v61, %s3247_s30  ;;  %2749 = vmatprep.subr.mxu1 %v4337_v49 }
 0x2a8   : > { %v911_v11 = vpop.permute.xlu1 %910  ;;  %v909_v12 = vpop.permute.xlu0 %908 }
 0x2a9   : > { %2750 = vmatpush3.xpose.msk.msra.mxu1 %vm532_vm3, %v521_v5 }
 0x2aa   : > { %1542 = vrot.lane.b32.xlu0 %v3422_v60, %s3247_s30  ;;  %2751 = vmatprep.subr.mxu1 %v4337_v49 }
 0x2ac   : > { %v907_v13 = vpop.permute.xlu1 %906  ;;  %v893_v14 = vpop.permute.xlu0 %892 }
 0x2ad   : > { %2752 = vmatpush3.xpose.msk.msra.mxu1 %vm532_vm3, %v519_v6 }
 0x2ae   : > { %1538 = vrot.lane.b32.xlu0 %v3428_v62, %s3247_s30  ;;  %2809 = vmatprep.subr.mxu1 %v4337_v49  ;;  %s4304_s30 = scalar_lea.vmem %s4336_s6, %s3056_s23 }
 0x2b0   : > { %v1332_v15 = vpop.permute.xlu1 %1331  ;;  %2754 = vmatmul.mubr.msk.f32.vlgmr.msra.gmra.mxu1 %vm532_vm3, %v3428_v62  ;;  %v895_v16 = vpop.permute.xlu0 %894 }
 0x2b1   : > { %2810 = vmatpush3.xpose.msk.msra.mxu1 %vm532_vm3, %v919_v7  ;;  %2756 = vmatprep.mubr.msk.f32.mxu1 %vm3237_vm2, %v4337_v49 }
 0x2b2   : > { %1961 = vrot.lane.b32.xlu0 %v3413_v54, %s3248_s7  ;;  %2811 = vmatprep.subr.mxu1 %v4337_v49 }
 0x2b4   : > { %v1330_v17 = vpop.permute.xlu1 %1329  ;;  %2757 = vmatmul.mubr.msk.f32.gmra.mxu1 %vm532_vm3, %v3430_v63  ;;  %v897_v20 = vpop.permute.xlu0 %896 }
 0x2b5   : > { %2812 = vmatpush3.xpose.msk.msra.mxu1 %vm532_vm3, %v917_v8  ;;  %2759 = vmatprep.mubr.msk.f32.mxu1 %vm3237_vm2, %v4337_v49 }
 0x2b6   : > { %2813 = vmatprep.subr.mxu1 %v4337_v49 }
 0x2b8   : > { %v1328_v21 = vpop.permute.xlu1 %1327  ;;  %2760 = vmatmul.mubr.msk.f32.gmra.mxu1 %vm532_vm3, %v3422_v60  ;;  %v899_v22 = vpop.permute.xlu0 %898 }
 0x2b9   : > { %2814 = vmatpush3.xpose.msk.msra.mxu1 %vm532_vm3, %v915_v9  ;;  %2762 = vmatprep.mubr.msk.f32.mxu1 %vm3237_vm2, %v4337_v49 }
 0x2ba   : > { %2815 = vmatprep.subr.mxu1 %v4337_v49 }
 0x2bc   : > { %v1326_v18 = vpop.permute.xlu1 %1325  ;;  %2763 = vmatmul.mubr.msk.f32.gmra.mxu1 %vm532_vm3, %v3424_v61  ;;  %v901_v23 = vpop.permute.xlu0 %900 }
 0x2bd   : > { %2816 = vmatpush3.xpose.msk.msra.mxu1 %vm532_vm3, %v913_v10  ;;  %2765 = vmatprep.mubr.msk.f32.mxu1 %vm3237_vm2, %v4337_v49 }
 0x2be   : > { %2817 = vmatprep.subr.mxu1 %v4337_v49 }
 0x2c0   : > { %v1324_v24 = vpop.permute.xlu1 %1323  ;;  %2766 = vmatmul.mubr.msk.f32.gmra.mxu1 %vm532_vm3, %v3416_v57  ;;  %v903_v25 = vpop.permute.xlu0 %902 }
 0x2c1   : > { %2818 = vmatpush3.xpose.msk.msra.mxu1 %vm532_vm3, %v911_v11  ;;  %2768 = vmatprep.mubr.msk.f32.mxu1 %vm3237_vm2, %v4337_v49 }
 0x2c2   : > { %2819 = vmatprep.subr.mxu1 %v4337_v49 }
 0x2c4   : > { %v1322_v28 = vpop.permute.xlu1 %1321  ;;  %2769 = vmatmul.mubr.msk.f32.gmra.mxu1 %vm532_vm3, %v3413_v54  ;;  %v905_v29 = vpop.permute.xlu0 %904 }
 0x2c5   : > { %2820 = vmatpush3.xpose.msk.msra.mxu1 %vm532_vm3, %v909_v12  ;;  %2771 = vmatprep.mubr.msk.f32.mxu1 %vm3237_vm2, %v4337_v49 }
 0x2c6   : > { %2821 = vmatprep.subr.mxu1 %v4337_v49 }
 0x2c8   : > { %v1320_v26 = vpop.permute.xlu1 %1319  ;;  %2772 = vmatmul.mubr.msk.f32.gmra.mxu1 %vm532_vm3, %v3418_v58  ;;  %v1306_v30 = vpop.permute.xlu0 %1305 }
 0x2c9   : > { %2822 = vmatpush3.xpose.msk.msra.mxu1 %vm532_vm3, %v907_v13  ;;  %2823 = vmatprep.mubr.msk.f32.mxu1 %vm3237_vm2, %v4337_v49 }
 0x2ca   : > { %2879 = vmatprep.subr.mxu1 %v4337_v49 }
 0x2cc   : > { %v1745_v19 = vpop.permute.xlu1 %1744  ;;  %2824 = vmatmul.mubr.msk.f32.vlgmr.msra.gmra.mxu1 %vm532_vm3, %v893_v14  ;;  %v1308_v31 = vpop.permute.xlu0 %1307 }
 0x2cd   : > { %2880 = vmatpush3.xpose.msk.msra.mxu1 %vm532_vm3, %v1332_v15  ;;  %2826 = vmatprep.mubr.msk.f32.mxu1 %vm3237_vm2, %v4337_v49 }
 0x2ce   : > { %2881 = vmatprep.subr.mxu1 %v4337_v49 }
 0x2d0   : > { %v1743_v32 = vpop.permute.xlu1 %1742  ;;  %2827 = vmatmul.mubr.msk.f32.gmra.mxu1 %vm532_vm3, %v895_v16  ;;  %v1310_v33 = vpop.permute.xlu0 %1309 }
 0x2d1   : > { %2882 = vmatpush3.xpose.msk.msra.mxu1 %vm532_vm3, %v1330_v17  ;;  %2829 = vmatprep.mubr.msk.f32.mxu1 %vm3237_vm2, %v4337_v49 }
 0x2d2   : > { %2883 = vmatprep.subr.mxu1 %v4337_v49 }
 0x2d4   : > { %v1741_v27 = vpop.permute.xlu1 %1740  ;;  %2830 = vmatmul.mubr.msk.f32.gmra.mxu1 %vm532_vm3, %v897_v20  ;;  %v1312_v34 = vpop.permute.xlu0 %1311 }
 0x2d5   : > { %2884 = vmatpush3.xpose.msk.msra.mxu1 %vm532_vm3, %v1328_v21  ;;  %2832 = vmatprep.mubr.msk.f32.mxu1 %vm3237_vm2, %v4337_v49 }
 0x2d6   : > { %2885 = vmatprep.subr.mxu1 %v4337_v49 }
 0x2d8   : > { %v1739_v35 = vpop.permute.xlu1 %1738  ;;  %2833 = vmatmul.mubr.msk.f32.gmra.mxu1 %vm532_vm3, %v899_v22  ;;  %v1314_v38 = vpop.permute.xlu0 %1313 }
 0x2d9   : > { %2886 = vmatpush3.xpose.msk.msra.mxu1 %vm532_vm3, %v1326_v18  ;;  %2835 = vmatprep.mubr.msk.f32.mxu1 %vm3237_vm2, %v4337_v49 }
 0x2da   : > { %2887 = vmatprep.subr.mxu1 %v4337_v49 }
 0x2dc   : > { %v1737_v36 = vpop.permute.xlu1 %1736  ;;  %2836 = vmatmul.mubr.msk.f32.gmra.mxu1 %vm532_vm3, %v901_v23  ;;  %v1316_v40 = vpop.permute.xlu0 %1315 }
 0x2dd   : > { %2888 = vmatpush3.xpose.msk.msra.mxu1 %vm532_vm3, %v1324_v24  ;;  %2838 = vmatprep.mubr.msk.f32.mxu1 %vm3237_vm2, %v4337_v49 }
 0x2de   : > { %2889 = vmatprep.subr.mxu1 %v4337_v49 }
 0x2e0   : > { %v1735_v39 = vpop.permute.xlu1 %1734  ;;  %2839 = vmatmul.mubr.msk.f32.gmra.mxu1 %vm532_vm3, %v903_v25  ;;  %v1318_v41 = vpop.permute.xlu0 %1317 }
 0x2e1   : > { %2890 = vmatpush3.xpose.msk.msra.mxu1 %vm532_vm3, %v1322_v28  ;;  %2841 = vmatprep.mubr.msk.f32.mxu1 %vm3237_vm2, %v4337_v49 }
 0x2e2   : > { %2891 = vmatprep.subr.mxu1 %v4337_v49 }
 0x2e4   : > { %v1733_v37 = vpop.permute.xlu1 %1732  ;;  %2842 = vmatmul.mubr.msk.f32.gmra.mxu1 %vm532_vm3, %v905_v29  ;;  %v1719_v44 = vpop.permute.xlu0 %1718 }
 0x2e5   : > { %2892 = vmatpush3.xpose.msk.msra.mxu1 %vm532_vm3, %v1320_v26  ;;  %2893 = vmatprep.mubr.msk.f32.mxu1 %vm3237_vm2, %v4337_v49 }
 0x2e6   : > { %2949 = vmatprep.subr.mxu1 %v4337_v49 }
 0x2e8   : > { %v1721_v42 = vpop.permute.xlu1 %1720  ;;  %2894 = vmatmul.mubr.msk.f32.vlgmr.msra.gmra.mxu1 %vm532_vm3, %v1306_v30  ;;  %v1723_v46 = vpop.permute.xlu0 %1722 }
 0x2e9   : > { %2950 = vmatpush3.xpose.msk.msra.mxu1 %vm532_vm3, %v1745_v19  ;;  %2896 = vmatprep.mubr.msk.f32.mxu1 %vm3237_vm2, %v4337_v49 }
 0x2ea   : > { %2951 = vmatprep.subr.mxu1 %v4337_v49 }
 0x2ec   : > { %v1725_v43 = vpop.permute.xlu1 %1724  ;;  %2897 = vmatmul.mubr.msk.f32.gmra.mxu1 %vm532_vm3, %v1308_v31  ;;  %v1727_v50 = vpop.permute.xlu0 %1726 }
 0x2ed   : > { %2952 = vmatpush3.xpose.msk.msra.mxu1 %vm532_vm3, %v1743_v32  ;;  %2899 = vmatprep.mubr.msk.f32.mxu1 %vm3237_vm2, %v4337_v49 }
 0x2ee   : > { %2953 = vmatprep.subr.mxu1 %v4337_v49 }
 0x2f0   : > { %v1729_v45 = vpop.permute.xlu1 %1728  ;;  %2900 = vmatmul.mubr.msk.f32.gmra.mxu1 %vm532_vm3, %v1310_v33  ;;  %v1731_v52 = vpop.permute.xlu0 %1730 }
 0x2f1   : > { %2954 = vmatpush3.xpose.msk.msra.mxu1 %vm532_vm3, %v1741_v27  ;;  %2902 = vmatprep.mubr.msk.f32.mxu1 %vm3237_vm2, %v4337_v49 }
 0x2f2   : > { %2955 = vmatprep.subr.mxu1 %v4337_v49 }
 0x2f4   : > { %v749_v47 = vpop.permute.xlu1 %748  ;;  %2903 = vmatmul.mubr.msk.f32.gmra.mxu1 %vm532_vm3, %v1312_v34  ;;  %v751_v55 = vpop.permute.xlu0 %750 }
 0x2f5   : > { %2956 = vmatpush3.xpose.msk.msra.mxu1 %vm532_vm3, %v1739_v35  ;;  %2905 = vmatprep.mubr.msk.f32.mxu1 %vm3237_vm2, %v4337_v49 }
 0x2f6   : > { %2957 = vmatprep.subr.mxu1 %v4337_v49 }
 0x2f8   : > { %v747_v48 = vpop.permute.xlu1 %746  ;;  %2906 = vmatmul.mubr.msk.f32.gmra.mxu1 %vm532_vm3, %v1314_v38  ;;  %v745_v59 = vpop.permute.xlu0 %744 }
 0x2f9   : > { %2958 = vmatpush3.xpose.msk.msra.mxu1 %vm532_vm3, %v1737_v36  ;;  %2908 = vmatprep.mubr.msk.f32.mxu1 %vm3237_vm2, %v4337_v49 }
 0x2fa   : > { %2959 = vmatprep.subr.mxu1 %v4337_v49 }
 0x2fc   : > { %v3622_v51 = vpop.permute.xlu1 %1133  ;;  %2909 = vmatmul.mubr.msk.f32.gmra.mxu1 %vm532_vm3, %v1316_v40  ;;  %v743_v1 = vpop.permute.xlu0 %742 }
 0x2fd   : > { %2960 = vmatpush3.xpose.msk.msra.mxu1 %vm532_vm3, %v1735_v39  ;;  %2911 = vmatprep.mubr.msk.f32.mxu1 %vm3237_vm2, %v4337_v49 }
 0x2fe   : > { %2961 = vmatprep.subr.mxu1 %v4337_v49 }
 0x300   : > { %v3629_v53 = vpop.permute.xlu1 %1127  ;;  %2912 = vmatmul.mubr.msk.f32.gmra.mxu1 %vm532_vm3, %v1318_v41  ;;  %v741_v2 = vpop.permute.xlu0 %740 }
 0x301   : > { %2962 = vmatpush3.xpose.msk.msra.mxu1 %vm532_vm3, %v1733_v37  ;;  %2963 = vmatprep.mubr.msk.f32.mxu1 %vm3237_vm2, %v4337_v49 }
 0x302   : > { %3048 = vmatprep.subr.mxu1 %v4337_v49 }
 0x304   : > { %v3636_v54 = vpop.permute.xlu1 %1546  ;;  %2964 = vmatmul.mubr.msk.f32.vlgmr.msra.gmra.mxu1 %vm532_vm3, %v1719_v44 }
 0x305   : > { %2966 = vmatprep.mubr.msk.f32.mxu1 %vm3237_vm2, %v4337_v49 }
 0x308   : > { %v3641_v56 = vpop.permute.xlu1 %1540  ;;  %2967 = vmatmul.mubr.msk.f32.gmra.mxu1 %vm532_vm3, %v1721_v42 }
 0x309   : > { %2969 = vmatprep.mubr.msk.f32.mxu1 %vm3237_vm2, %v4337_v49 }
 0x30c   : > { %v753_v0 = vpop.permute.xlu1 %752  ;;  %2970 = vmatmul.mubr.msk.f32.gmra.mxu1 %vm532_vm3, %v1723_v46 }
 0x30d   : > { %2775 = vmatpush3.msk.msra.mxu0 %vm781_vm4, %v753_v0  ;;  %2972 = vmatprep.mubr.msk.f32.mxu1 %vm3237_vm2, %v4337_v49 }
 0x30e   : > { %2776 = vmatprep.subr.mxu0 %v4337_v49 }
 0x30f   : > { %2777 = vmatpush3.msra.mxu0 %v751_v55 }
 0x310   : > { %2778 = vmatprep.subr.mxu0 %v4337_v49  ;;  %2973 = vmatmul.mubr.msk.f32.gmra.mxu1 %vm532_vm3, %v1725_v43 }
 0x311   : > { %2779 = vmatpush3.msra.mxu0 %v749_v47  ;;  %2975 = vmatprep.mubr.msk.f32.mxu1 %vm3237_vm2, %v4337_v49 }
 0x312   : > { %2780 = vmatprep.subr.mxu0 %v4337_v49 }
 0x313   : > { %2781 = vmatpush3.msra.mxu0 %v747_v48 }
 0x314   : > { %2782 = vmatprep.subr.mxu0 %v4337_v49  ;;  %2976 = vmatmul.mubr.msk.f32.gmra.mxu1 %vm532_vm3, %v1727_v50 }
 0x315   : > { %2783 = vmatpush3.msra.mxu0 %v745_v59  ;;  %2978 = vmatprep.mubr.msk.f32.mxu1 %vm3237_vm2, %v4337_v49 }
 0x316   : > { %2784 = vmatprep.subr.mxu0 %v4337_v49 }
 0x317   : > { %2785 = vmatpush3.msra.mxu0 %v743_v1 }
 0x318   : > { %2786 = vmatprep.subr.mxu0 %v4337_v49  ;;  %2979 = vmatmul.mubr.msk.f32.gmra.mxu1 %vm532_vm3, %v1729_v45 }
 0x319   : > { %2787 = vmatpush3.msra.mxu0 %v741_v2  ;;  %2981 = vmatprep.mubr.msk.f32.mxu1 %vm3237_vm2, %v4337_v49 }
 0x31a   : > { %2844 = vmatprep.subr.mxu0 %v4337_v49 }
 0x31c   : > { %2982 = vmatmul.mubr.msk.f32.gmra.mxu1 %vm532_vm3, %v1731_v52 }
 0x31d   : > { %3033 = vmatprep.mubr.msk.f32.mxu1 %vm3237_vm2, %v4337_v49 }
 0x370   : > { %v3669_v3 = vpop.f32.mrf.mxu1 }
 0x371   : > { %v662_v4 = vsel %vm661_vm5, %v3669_v3, -inf }
 0x372   : > { %663 = vmax.xlane.f32.xlu1 %v662_v4  ;;  %v2755_v5 = vpop.f32.mrf.mxu1 }
 0x374   : > { %v3673_v6 = vpop.f32.mrf.mxu1 }
 0x375   : > { %v665_v7 = vsel %vm661_vm5, %v3673_v6, -inf }
 0x376   : > { %666 = vmax.xlane.f32.xlu0 %v665_v7  ;;  %v2758_v8 = vpop.f32.mrf.mxu1 }
 0x378   : > { %v3677_v9 = vpop.f32.mrf.mxu1 }
 0x379   : > { %v668_v10 = vsel %vm661_vm5, %v3677_v9, -inf }
 0x37a   : > { %669 = vmax.xlane.f32.xlu0 %v668_v10  ;;  %v2761_v11 = vpop.f32.mrf.mxu1 }
 0x37c   : > { %v3681_v12 = vpop.f32.mrf.mxu1 }
 0x37d   : > { %v671_v13 = vsel %vm661_vm5, %v3681_v12, -inf }
 0x37e   : > { %672 = vmax.xlane.f32.xlu0 %v671_v13  ;;  %v2764_v14 = vpop.f32.mrf.mxu1 }
 0x380   : > { %v3685_v15 = vpop.f32.mrf.mxu1 }
 0x381   : > { %v674_v40 = vsel %vm661_vm5, %v3685_v15, -inf }
 0x382   : > { %v2767_v16 = vpop.f32.mrf.mxu1 }
 0x383   : > { %1963 = vrot.lane.b32.xlu1 %v3418_v58, %s3248_s7 }
 0x384   : > { %v3689_v17 = vpop.f32.mrf.mxu1 }
 0x385   : > { %v677_v20 = vsel %vm661_vm5, %v3689_v17, -inf }
 0x386   : > { %678 = vmax.xlane.f32.xlu0 %v677_v20  ;;  %v2770_v21 = vpop.f32.mrf.mxu1 }
 0x388   : > { %v3693_v22 = vpop.f32.mrf.mxu1 }
 0x389   : > { %v681_v42 = vsel %vm680_vm6, %v3693_v22, -inf }
 0x38a   : > { %v2773_v18 = vpop.f32.mrf.mxu1 }
 0x38c   : > { %v3695_v23 = vpop.f32.mrf.mxu1 }
 0x38d   : > { %v1048_v24 = vsel %vm661_vm5, %v3695_v23, -inf }
 0x38e   : > { %1049 = vmax.xlane.f32.xlu0 %v1048_v24  ;;  %v2825_v25 = vpop.f32.mrf.mxu1 }
 0x390   : > { %v3699_v28 = vpop.f32.mrf.mxu1 }
 0x391   : > { %v1051_v46 = vsel %vm661_vm5, %v3699_v28, -inf }
 0x392   : > { %v2828_v58 = vpop.f32.mrf.mxu1 }
 0x394   : > { %v3701_v29 = vpop.f32.mrf.mxu1 }
 0x395   : > { %v1054_v26 = vsel %vm661_vm5, %v3701_v29, -inf }
 0x396   : > { %1055 = vmax.xlane.f32.xlu0 %v1054_v26  ;;  %v2831_v30 = vpop.f32.mrf.mxu1  ;;  %v3763_v26 = vpop.permute.xlu0 %1135 }
 0x398   : > { %v3705_v19 = vpop.f32.mrf.mxu1 }
 0x399   : > { %v1057_v50 = vsel %vm661_vm5, %v3705_v19, -inf }
 0x39a   : > { %v2834_v31 = vpop.f32.mrf.mxu1 }
 0x39c   : > { %v3707_v32 = vpop.f32.mrf.mxu1 }
 0x39d   : > { %v1060_v33 = vsel %vm661_vm5, %v3707_v32, -inf }
 0x39e   : > { %1061 = vmax.xlane.f32.xlu0 %v1060_v33  ;;  %v2837_v27 = vpop.f32.mrf.mxu1 }
 0x3a0   : > { %v3711_v34 = vpop.f32.mrf.mxu1 }
 0x3a1   : > { %v1063_v0 = vsel %vm661_vm5, %v3711_v34, -inf }
 0x3a2   : > { %v2840_v35 = vpop.f32.mrf.mxu1 }
 0x3a3   : > { %v3771_v35 = vpop.permute.xlu0 %1131 }
 0x3a4   : > { %v3713_v38 = vpop.f32.mrf.mxu1 }
 0x3a5   : > { %v1066_v36 = vsel %vm680_vm6, %v3713_v38, -inf }
 0x3a6   : > { %1067 = vmax.xlane.f32.xlu0 %v1066_v36  ;;  %v2843_v39 = vpop.f32.mrf.mxu1 }
 0x3a7   : > { %675 = vmax.xlane.f32.xlu1 %v674_v40 }
 0x3a8   : > { %v3719_v37 = vpop.f32.mrf.mxu1 }
 0x3a9   : > { %v1461_v4 = vsel %vm661_vm5, %v3719_v37, -inf }
 0x3aa   : > { %v2895_v41 = vpop.f32.mrf.mxu1 }
 0x3ab   : > { %682 = vmax.xlane.f32.xlu1 %v681_v42 }
 0x3ac   : > { %v3723_v43 = vpop.f32.mrf.mxu1 }
 0x3ad   : > { %v1464_v44 = vsel %vm661_vm5, %v3723_v43, -inf }
 0x3ae   : > { %1465 = vmax.xlane.f32.xlu0 %v1464_v44  ;;  %v2898_v45 = vpop.f32.mrf.mxu1  ;;  %v3779_v44 = vpop.permute.xlu0 %1129 }
 0x3af   : > { %1052 = vmax.xlane.f32.xlu1 %v1051_v46 }
 0x3b0   : > { %v3729_v47 = vpop.f32.mrf.mxu1 }
 0x3b1   : > { %v1467_v10 = vsel %vm661_vm5, %v3729_v47, -inf }
 0x3b2   : > { %v2901_v48 = vpop.f32.mrf.mxu1 }
 0x3b3   : > { %1058 = vmax.xlane.f32.xlu1 %v1057_v50 }
 0x3b4   : > { %v3733_v52 = vpop.f32.mrf.mxu1 }
 0x3b5   : > { %v1470_v55 = vsel %vm661_vm5, %v3733_v52, -inf }
 0x3b6   : > { %1471 = vmax.xlane.f32.xlu0 %v1470_v55  ;;  %v2904_v59 = vpop.f32.mrf.mxu1  ;;  %v3787_v55 = vpop.permute.xlu0 %1125 }
 0x3b7   : > { %1064 = vmax.xlane.f32.xlu1 %v1063_v0 }
 0x3b8   : > { %v3739_v1 = vpop.f32.mrf.mxu1 }
 0x3b9   : > { %v1473_v14 = vsel %vm661_vm5, %v3739_v1, -inf }
 0x3ba   : > { %v2907_v2 = vpop.f32.mrf.mxu1 }
 0x3bb   : > { %1462 = vmax.xlane.f32.xlu1 %v1461_v4  ;;  %v3791_v2 = vpop.permute.xlu0 %1548 }
 0x3bc   : > { %v3743_v5 = vpop.f32.mrf.mxu1 }
 0x3bd   : > { %v1476_v7 = vsel %vm661_vm5, %v3743_v5, -inf }
 0x3be   : > { %1477 = vmax.xlane.f32.xlu0 %v1476_v7  ;;  %v2910_v8 = vpop.f32.mrf.mxu1 }
 0x3bf   : > { %1468 = vmax.xlane.f32.xlu1 %v1467_v10  ;;  %v3793_v4 = vpop.permute.xlu0 %1544  ;;  %v3797_v8 = vpop.permute.xlu1 %1137 }
 0x3c0   : > { %v3749_v11 = vpop.f32.mrf.mxu1 }
 0x3c1   : > { %v1479_v18 = vsel %vm680_vm6, %v3749_v11, -inf }
 0x3c2   : > { %v2913_v13 = vpop.f32.mrf.mxu1 }
 0x3c3   : > { %1474 = vmax.xlane.f32.xlu1 %v1473_v14  ;;  %v3795_v7 = vpop.permute.xlu0 %1542  ;;  %v3801_v13 = vpop.permute.xlu1 %1550 }
 0x3c4   : > { %v3753_v16 = vpop.f32.mrf.mxu1 }
 0x3c5   : > { %v1874_v20 = vsel %vm661_vm5, %v3753_v16, -inf }
 0x3c6   : > { %1875 = vmax.xlane.f32.xlu0 %v1874_v20  ;;  %v2965_v21 = vpop.f32.mrf.mxu1 }
 0x3c7   : > { %1480 = vmax.xlane.f32.xlu1 %v1479_v18  ;;  %v3799_v10 = vpop.permute.xlu0 %1538 }
 0x3c8   : > { %v3759_v24 = vpop.f32.mrf.mxu1 }
 0x3c9   : > { %v1877_v25 = vsel %vm661_vm5, %v3759_v24, -inf }
 0x3ca   : > { %v2968_v58 = vpop.f32.mrf.mxu1 }
 0x3cb   : > { %1878 = vmax.xlane.f32.xlu1 %v1877_v25  ;;  %v3803_v14 = vpop.permute.xlu0 %1961 }
 0x3cc   : > { %v3765_v30 = vpop.f32.mrf.mxu1  ;;  %4339 = vst [vmem:[#allocation3_spill] sm:$0xff] %v3803_v14 }
 0x3cd   : > { %v1880_v31 = vsel %vm661_vm5, %v3765_v30, -inf }
 0x3ce   : > { %v2971_v33 = vpop.f32.mrf.mxu1 }
 0x3cf   : > { %1881 = vmax.xlane.f32.xlu1 %v1880_v31 }
 0x3d0   : > { %v3769_v27 = vpop.f32.mrf.mxu1 }
 0x3d1   : > { %v1883_v36 = vsel %vm661_vm5, %v3769_v27, -inf }
 0x3d2   : > { %v2974_v39 = vpop.f32.mrf.mxu1 }
 0x3d3   : > { %1884 = vmax.xlane.f32.xlu1 %v1883_v36 }
 0x3d4   : > { %v3775_v40 = vpop.f32.mrf.mxu1 }
 0x3d5   : > { %v1886_v41 = vsel %vm661_vm5, %v3775_v40, -inf }
 0x3d6   : > { %v2977_v42 = vpop.f32.mrf.mxu1 }
 0x3d7   : > { %1887 = vmax.xlane.f32.xlu1 %v1886_v41 }
 0x3d8   : > { %v3781_v45 = vpop.f32.mrf.mxu1 }
 0x3d9   : > { %v1889_v46 = vsel %vm661_vm5, %v3781_v45, -inf }
 0x3da   : > { %1890 = vmax.xlane.f32.xlu0 %v1889_v46  ;;  %v2980_v48 = vpop.f32.mrf.mxu1 }
 0x3dc   : > { %v3785_v50 = vpop.f32.mrf.mxu1 }
 0x3dd   : > { %v1892_v59 = vsel %vm680_vm6, %v3785_v50, -inf }
 0x3de   : > { %1893 = vmax.xlane.f32.xlu1 %v1892_v59  ;;  %v2983_v0 = vpop.f32.mrf.mxu1 }
 0x3fb   : > { %v664_v20 = vpop.xlane.xlu1 %663 }
 0x3fc   : > { %v684_v21 = vsub.f32 %v3669_v3, %v664_v20 }
 0x3fe   : > { %v691_v18 = vmul.f32 1.442695, %v684_v21 }
 0x3ff   : > { %v667_v25 = vpop.xlane.xlu0 %666  ;;  %v3825_v21 = vpop.permute.xlu1 %1963 }
 0x400   : > { %3095 = vpow2.f32 %v691_v18  ;;  %v685_v58 = vsub.f32 %v3673_v6, %v667_v25 }
 0x402   : > { %v693_v31 = vmul.f32 1.442695, %v685_v58 }
 0x403   : > { %v670_v33 = vpop.xlane.xlu0 %669 }
 0x404   : > { %3097 = vpow2.f32 %v693_v31  ;;  %v686_v36 = vsub.f32 %v3677_v9, %v670_v33 }
 0x406   : > { %v695_v39 = vmul.f32 1.442695, %v686_v36 }
 0x407   : > { %v673_v41 = vpop.xlane.xlu0 %672 }
 0x408   : > { %3099 = vpow2.f32 %v695_v39  ;;  %v687_v42 = vsub.f32 %v3681_v12, %v673_v41 }
 0x40a   : > { %v697_v46 = vmul.f32 1.442695, %v687_v42 }
 0x40c   : > { %3101 = vpow2.f32 %v697_v46 }
 0x40d   : > { %v3809_v48 = vpop.eup %3095 }
 0x40e   : > { %v705_v3 = vsel %vm661_vm5, %v3809_v48, 0.0 }
 0x40f   : > { %706 = vadd.xlane.f32.xlu0 %v705_v3  ;;  %v679_v18 = vpop.xlane.xlu0 %678 }
 0x410   : > { %v689_v25 = vsub.f32 %v3689_v17, %v679_v18 }
 0x411   : > { %v3813_v59 = vpop.eup %3097 }
 0x412   : > { %v708_v6 = vsel %vm661_vm5, %v3813_v59, 0.0  ;;  %v701_v33 = vmul.f32 1.442695, %v689_v25 }
 0x413   : > { %709 = vadd.xlane.f32.xlu0 %v708_v6 }
 0x415   : > { %v3817_v9 = vpop.eup %3099 }
 0x416   : > { %v711_v0 = vsel %vm661_vm5, %v3817_v9, 0.0 }
 0x417   : > { %712 = vadd.xlane.f32.xlu0 %v711_v0  ;;  %v1050_v18 = vpop.xlane.xlu0 %1049 }
 0x419   : > { %v3821_v12 = vpop.eup %3101 }
 0x41a   : > { %v714_v20 = vsel %vm661_vm5, %v3821_v12, 0.0 }
 0x41b   : > { %715 = vadd.xlane.f32.xlu0 %v714_v20 }
 0x430   : > { %v676_v58 = vpop.xlane.xlu1 %675 }
 0x431   : > { %v688_v31 = vsub.f32 %v3685_v15, %v676_v58  ;;  %v1056_v58 = vpop.xlane.xlu0 %1055 }
 0x433   : > { %v699_v36 = vmul.f32 1.442695, %v688_v31  ;;  %v1069_v31 = vsub.f32 %v3695_v23, %v1050_v18 }
 0x434   : > { %v683_v39 = vpop.xlane.xlu1 %682 }
 0x435   : > { %3103 = vpow2.f32 %v699_v36  ;;  %v690_v41 = vsub.f32 %v3693_v22, %v683_v39 }
 0x436   : > { %3105 = vpow2.f32 %v701_v33  ;;  %v1062_v33 = vpop.xlane.xlu0 %1061 }
 0x437   : > { %v703_v42 = vmul.f32 1.442695, %v690_v41  ;;  %v1076_v41 = vmul.f32 1.442695, %v1069_v31 }
 0x438   : > { %v1053_v22 = vpop.xlane.xlu1 %1052 }
 0x439   : > { %3107 = vpow2.f32 %v703_v42  ;;  %v1070_v36 = vsub.f32 %v3699_v28, %v1053_v22  ;;  %v1071_v42 = vsub.f32 %v3701_v29, %v1056_v58 }
 0x43a   : > { %3109 = vpow2.f32 %v1076_v41 }
 0x43c   : > { %v1059_v20 = vpop.xlane.xlu1 %1058 }
 0x43d   : > { %v1072_v23 = vsub.f32 %v3705_v19, %v1059_v20 }
 0x43f   : > { %v1082_v28 = vmul.f32 1.442695, %v1072_v23 }
 0x440   : > { %v1065_v25 = vpop.xlane.xlu1 %1064 }
 0x441   : > { %v1074_v22 = vsub.f32 %v3711_v34, %v1065_v25 }
 0x442   : > { %v3830_v46 = vpop.eup %3103 }
 0x443   : > { %v717_v3 = vsel %vm661_vm5, %v3830_v46, 0.0  ;;  %v3834_v6 = vpop.eup %3105 }
 0x444   : > { %718 = vadd.xlane.f32.xlu0 %v717_v3  ;;  %v720_v0 = vsel %vm661_vm5, %v3834_v6, 0.0  ;;  %v1463_v39 = vpop.xlane.xlu1 %1462  ;;  %v1073_v3 = vsub.f32 %v3707_v32, %v1062_v33  ;;  %v1086_v32 = vmul.f32 1.442695, %v1074_v22 }
 0x445   : > { %v1482_v58 = vsub.f32 %v3719_v37, %v1463_v39 }
 0x446   : > { %v3836_v17 = vpop.eup %3107  ;;  %v1084_v14 = vmul.f32 1.442695, %v1073_v3 }
 0x447   : > { %v723_v15 = vsel %vm680_vm6, %v3836_v17, 0.0  ;;  %v3860_v33 = vpop.eup %3109  ;;  %v1489_v19 = vmul.f32 1.442695, %v1482_v58 }
 0x448   : > { %724 = vadd.xlane.f32.xlu1 %v723_v15  ;;  %721 = vadd.xlane.f32.xlu0 %v720_v0  ;;  %v1068_v15 = vpop.xlane.xlu0 %1067  ;;  %v1078_v0 = vmul.f32 1.442695, %v1070_v36  ;;  %v1090_v20 = vsel %vm661_vm5, %v3860_v33, 0.0 }
 0x449   : > { %v1075_v49 = vsub.f32 %v3713_v38, %v1068_v15 }
 0x44a   : > { %3111 = vpow2.f32 %v1078_v0 }
 0x44b   : > { %v1088_v18 = vmul.f32 1.442695, %v1075_v49 }
 0x44c   : > { %v3856_v31 = vpop.xlane.xlu0 %1465 }
 0x450   : > { %v1472_v34 = vpop.xlane.xlu0 %1471 }
 0x451   : > { %v1485_v37 = vsub.f32 %v3733_v52, %v1472_v34 }
 0x453   : > { %v1495_v0 = vmul.f32 1.442695, %v1485_v37 }
 0x459   : > { %1959 = vrot.lane.b32.xlu1 %v3416_v57, %s3248_s7  ;;  %v1080_v57 = vmul.f32 1.442695, %v1071_v42  ;;  %v1478_v42 = vpop.xlane.xlu0 %1477 }
 0x45a   : > { %v1487_v52 = vsub.f32 %v3743_v5, %v1478_v42 }
 0x45b   : > { %3113 = vpow2.f32 %v1080_v57 }
 0x45c   : > { %3115 = vpow2.f32 %v1084_v14  ;;  %v3863_v14 = vpop.eup %3111  ;;  %v1499_v22 = vmul.f32 1.442695, %v1487_v52 }
 0x45d   : > { %3117 = vpow2.f32 %v1088_v18  ;;  %v1093_v39 = vsel %vm661_vm5, %v3863_v14, 0.0  ;;  %v1876_v23 = vpop.xlane.xlu0 %1875 }
 0x45e   : > { %1957 = vrot.lane.b32.xlu0 %v3424_v61, %s3248_s7  ;;  %v1469_v61 = vpop.xlane.xlu1 %1468  ;;  %3119 = vpow2.f32 %v1082_v28 }
 0x45f   : > { %3121 = vpow2.f32 %v1086_v32  ;;  %v1484_v49 = vsub.f32 %v3729_v47, %v1469_v61  ;;  %v1895_v32 = vsub.f32 %v3753_v16, %v1876_v23 }
 0x460   : > { %3123 = vpow2.f32 %v1489_v19 }
 0x461   : > { %v1493_v36 = vmul.f32 1.442695, %v1484_v49  ;;  %v1902_v19 = vmul.f32 1.442695, %v1895_v32 }
 0x462   : > { %v3853_v29 = vpop.xlane.xlu1 %1474 }
 0x463   : > { %3125 = vpow2.f32 %v1493_v36 }
 0x464   : > { %3127 = vpow2.f32 %v1495_v0 }
 0x465   : > { %3129 = vpow2.f32 %v1499_v22 }
 0x466   : > { %v3858_v38 = vpop.xlane.xlu1 %1480  ;;  %3131 = vpow2.f32 %v1902_v19 }
 0x468   : > { %v3867_v25 = vpop.eup %3113 }
 0x469   : > { %v3872_v41 = vpop.eup %3115  ;;  %v1096_v47 = vsel %vm661_vm5, %v3867_v25, 0.0 }
 0x46a   : > { %v3874_v3 = vpop.xlane.xlu1 %1878  ;;  %v3878_v15 = vpop.eup %3117  ;;  %v1102_v57 = vsel %vm661_vm5, %v3872_v41, 0.0 }
 0x46b   : > { %v3883_v61 = vpop.eup %3119  ;;  %v1108_v28 = vsel %vm680_vm6, %v3878_v15, 0.0 }
 0x46c   : > { %v1099_v5 = vsel %vm661_vm5, %v3883_v61, 0.0  ;;  %v3890_v58 = vpop.eup %3121 }
 0x46d   : > { %v1105_v34 = vsel %vm661_vm5, %v3890_v58, 0.0 }
 0x46e   : > { %v1882_v18 = vpop.xlane.xlu1 %1881 }
 0x46f   : > { %v1897_v49 = vsub.f32 %v3765_v30, %v1882_v18 }
 0x471   : > { %v1906_v16 = vmul.f32 1.442695, %v1897_v49 }
 0x472   : > { %v1885_v37 = vpop.xlane.xlu1 %1884 }
 0x473   : > { %v1898_v36 = vsub.f32 %v3769_v27, %v1885_v37  ;;  %3133 = vpow2.f32 %v1906_v16  ;;  %v1483_v16 = vsub.f32 %v3723_v43, %v3856_v31 }
 0x475   : > { %v1908_v30 = vmul.f32 1.442695, %v1898_v36 }
 0x477   : > { %3135 = vpow2.f32 %v1908_v30  ;;  %v1486_v30 = vsub.f32 %v3739_v1, %v3853_v29  ;;  %v4340_v1 = vmov 0.0  }
 0x479   : > { %v1497_v31 = vmul.f32 1.442695, %v1486_v30 }
 0x47d   : > { %1094 = vadd.xlane.f32.xlu1 %v1093_v39  ;;  %1091 = vadd.xlane.f32.xlu0 %v1090_v20  ;;  %v3895_v20 = vpop.eup %3123 }
 0x47e   : > { %v1503_v39 = vsel %vm661_vm5, %v3895_v20, 0.0  ;;  %v3900_v42 = vpop.eup %3125 }
 0x47f   : > { %v1509_v52 = vsel %vm661_vm5, %v3900_v42, 0.0 }
 0x481   : > { %1097 = vadd.xlane.f32.xlu1 %v1096_v47  ;;  %1103 = vadd.xlane.f32.xlu0 %v1102_v57  ;;  %v1891_v47 = vpop.xlane.xlu0 %1890  ;;  %v3905_v57 = vpop.eup %3127 }
 0x482   : > { %v1900_v0 = vsub.f32 %v3781_v45, %v1891_v47  ;;  %v1512_v27 = vsel %vm661_vm5, %v3905_v57, 0.0  ;;  %v3909_v18 = vpop.eup %3129  ;;  %v1491_v47 = vmul.f32 1.442695, %v1483_v16 }
 0x483   : > { %v1518_v22 = vsel %vm661_vm5, %v3909_v18, 0.0  ;;  %v3913_v45 = vpop.eup %3131 }
 0x484   : > { %v1912_v23 = vmul.f32 1.442695, %v1900_v0  ;;  %v3919_v19 = vpop.eup %3133 }
 0x485   : > { %1100 = vadd.xlane.f32.xlu1 %v1099_v5  ;;  %1109 = vadd.xlane.f32.xlu0 %v1108_v28  ;;  %v1916_v5 = vsel %vm661_vm5, %v3913_v45, 0.0  ;;  %v3923_v37 = vpop.eup %3135 }
 0x486   : > { %3137 = vpow2.f32 %v1912_v23  ;;  %v1925_v36 = vsel %vm661_vm5, %v3923_v37, 0.0  ;;  %v1488_v23 = vsub.f32 %v3749_v11, %v3858_v38  ;;  %v1896_v11 = vsub.f32 %v3759_v24, %v3874_v3 }
 0x488   : > { %v1501_v29 = vmul.f32 1.442695, %v1488_v23 }
 0x489   : > { %1106 = vadd.xlane.f32.xlu1 %v1105_v34  ;;  %v1922_v34 = vsel %vm661_vm5, %v3919_v19, 0.0 }
 0x48d   : > { %1504 = vadd.xlane.f32.xlu1 %v1503_v39 }
 0x491   : > { %1510 = vadd.xlane.f32.xlu1 %v1509_v52 }
 0x493   : > { %v3929_v39 = vpop.eup %3137 }
 0x494   : > { %v1931_v43 = vsel %vm661_vm5, %v3929_v39, 0.0 }
 0x495   : > { %1513 = vadd.xlane.f32.xlu1 %v1512_v27 }
 0x498   : > { %v707_v28 = vpop.xlane.xlu0 %706 }
 0x499   : > { %3139 = vrcp.f32 %v707_v28  ;;  %1519 = vadd.xlane.f32.xlu1 %v1518_v22 }
 0x49b   : > { %1955 = vrot.lane.b32.xlu0 %v3422_v60, %s3248_s7 }
 0x49c   : > { %v710_v32 = vpop.xlane.xlu0 %709 }
 0x49d   : > { %3141 = vrcp.f32 %v710_v32  ;;  %1917 = vadd.xlane.f32.xlu1 %v1916_v5 }
 0x4a0   : > { %v713_v49 = vpop.xlane.xlu0 %712 }
 0x4a1   : > { %3143 = vrcp.f32 %v713_v49  ;;  %1923 = vadd.xlane.f32.xlu1 %v1922_v34 }
 0x4a4   : > { %v716_v60 = vpop.xlane.xlu0 %715 }
 0x4a5   : > { %3145 = vrcp.f32 %v716_v60  ;;  %1926 = vadd.xlane.f32.xlu1 %v1925_v36 }
 0x4a6   : > { %v3140_v0 = vpop.eup %3139  ;;  %3147 = vpow2.f32 %v1491_v47 }
 0x4a7   : > { %v733_v52 = vmul.f32 %v3140_v0, %v3809_v48  ;;  %3149 = vpow2.f32 %v1497_v31 }
 0x4a8   : > { %3151 = vpow2.f32 %v1501_v29 }
 0x4a9   : > { %1932 = vadd.xlane.f32.xlu1 %v1931_v43  ;;  %2789 = vmatmul.mubr.msk.f32.vlgmr.msra.gmra.mxu0 %vm661_vm5, %v733_v52 }
 0x4aa   : > { %v3142_v27 = vpop.eup %3141  ;;  %2845 = vmatpush3.msk.msra.mxu0 %vm781_vm4, %v3797_v8  ;;  %2791 = vmatprep.mubr.msk.f32.mxu0 %vm3237_vm2, %v4340_v1  ;;  %v1888_v8 = vpop.xlane.xlu1 %1887 }
 0x4ab   : > { %2846 = vmatprep.subr.mxu0 %v4340_v1  ;;  %v734_v48 = vmul.f32 %v3142_v27, %v3813_v59  ;;  %v1904_v59 = vmul.f32 1.442695, %v1896_v11  ;;  %v1899_v24 = vsub.f32 %v3775_v40, %v1888_v8 }
 0x4ac   : > { %2847 = vmatpush3.msra.mxu0 %v3763_v26 }
 0x4ad   : > { %2848 = vmatprep.subr.mxu0 %v4340_v1  ;;  %2792 = vmatmul.mubr.msk.f32.gmra.mxu0 %vm661_vm5, %v734_v48  ;;  %3153 = vpow2.f32 %v1904_v59 }
 0x4ae   : > { %v3144_v38 = vpop.eup %3143  ;;  %2849 = vmatpush3.msra.mxu0 %v3622_v51  ;;  %2794 = vmatprep.mubr.msk.f32.mxu0 %vm3237_vm2, %v4340_v1  ;;  %v1894_v28 = vpop.xlane.xlu1 %1893 }
 0x4af   : > { %2850 = vmatprep.subr.mxu0 %v4340_v1  ;;  %v735_v26 = vmul.f32 %v3144_v38, %v3817_v9  ;;  %v1901_v40 = vsub.f32 %v3785_v50, %v1894_v28 }
 0x4b0   : > { %2851 = vmatpush3.msra.mxu0 %v3771_v35  ;;  %v1910_v35 = vmul.f32 1.442695, %v1899_v24 }
 0x4b1   : > { %2852 = vmatprep.subr.mxu0 %v4340_v1  ;;  %2795 = vmatmul.mubr.msk.f32.gmra.mxu0 %vm661_vm5, %v735_v26 }
 0x4b2   : > { %v3146_v3 = vpop.eup %3145  ;;  %2853 = vmatpush3.msra.mxu0 %v3779_v44  ;;  %2797 = vmatprep.mubr.msk.f32.mxu0 %vm3237_vm2, %v4340_v1  ;;  %3155 = vpow2.f32 %v1910_v35  ;;  %v1914_v44 = vmul.f32 1.442695, %v1901_v40 }
 0x4b3   : > { %2854 = vmatprep.subr.mxu0 %v4340_v1  ;;  %v736_v51 = vmul.f32 %v3146_v3, %v3821_v12  ;;  %v3968_v9 = vpop.eup %3147 }
 0x4b4   : > { %2855 = vmatpush3.msra.mxu0 %v3629_v53  ;;  %v1506_v53 = vsel %vm661_vm5, %v3968_v9, 0.0  ;;  %v3976_v12 = vpop.eup %3149  ;;  %3157 = vpow2.f32 %v1914_v44 }
 0x4b5   : > { %2856 = vmatprep.subr.mxu0 %v4340_v1  ;;  %2798 = vmatmul.mubr.msk.f32.gmra.mxu0 %vm661_vm5, %v736_v51  ;;  %v1515_v50 = vsel %vm661_vm5, %v3976_v12, 0.0 }
 0x4b6   : > { %2857 = vmatpush3.msra.mxu0 %v3787_v55  ;;  %2800 = vmatprep.mubr.msk.f32.mxu0 %vm3237_vm2, %v4340_v1  ;;  %v3982_v55 = vpop.eup %3151 }
 0x4b7   : > { %2914 = vmatprep.subr.mxu0 %v4340_v1  ;;  %v1521_v22 = vsel %vm680_vm6, %v3982_v55, 0.0 }
 0x4ba   : > { %1507 = vadd.xlane.f32.xlu0 %v1506_v53  ;;  %1953 = vrot.lane.b32.xlu1 %v3430_v63, %s3248_s7  ;;  %v3986_v32 = vpop.eup %3153 }
 0x4bb   : > { %v1919_v5 = vsel %vm661_vm5, %v3986_v32, 0.0 }
 0x4be   : > { %1516 = vadd.xlane.f32.xlu0 %v1515_v50 }
 0x4bf   : > { %v3990_v49 = vpop.eup %3155 }
 0x4c0   : > { %v1928_v63 = vsel %vm661_vm5, %v3990_v49, 0.0 }
 0x4c1   : > { %v3994_v34 = vpop.eup %3157 }
 0x4c2   : > { %1522 = vadd.xlane.f32.xlu0 %v1521_v22  ;;  %v1934_v60 = vsel %vm680_vm6, %v3994_v34, 0.0 }
 0x4c6   : > { %1920 = vadd.xlane.f32.xlu0 %v1919_v5 }
 0x4ca   : > { %1929 = vadd.xlane.f32.xlu0 %v1928_v63 }
 0x4cd   : > { %v719_v16 = vpop.xlane.xlu0 %718 }
 0x4ce   : > { %3159 = vrcp.f32 %v719_v16  ;;  %1935 = vadd.xlane.f32.xlu0 %v1934_v60 }
 0x4d1   : > { %v722_v36 = vpop.xlane.xlu0 %721  ;;  %v725_v47 = vpop.xlane.xlu1 %724 }
 0x4d2   : > { %3161 = vrcp.f32 %v722_v36 }
 0x4d3   : > { %3163 = vrcp.f32 %v725_v47 }
 0x4d5   : > { %v4014_v27 = vpop.permute.xlu0 %1957 }
 0x4db   : > { %v3160_v30 = vpop.eup %3159 }
 0x4dc   : > { %v737_v0 = vmul.f32 %v3160_v30, %v3830_v46  ;;  %v4012_v46 = vpop.permute.xlu1 %1959 }
 0x4de   : > { %2801 = vmatmul.mubr.msk.f32.gmra.mxu0 %vm661_vm5, %v737_v0 }
 0x4df   : > { %2803 = vmatprep.mubr.msk.f32.mxu0 %vm3237_vm2, %v4340_v1  ;;  %v3162_v52 = vpop.eup %3161 }
 0x4e0   : > { %v738_v43 = vmul.f32 %v3162_v52, %v3834_v6  ;;  %v3164_v31 = vpop.eup %3163 }
 0x4e1   : > { %v739_v23 = vmul.f32 %v3164_v31, %v3836_v17 }
 0x4e2   : > { %2804 = vmatmul.mubr.msk.f32.gmra.mxu0 %vm661_vm5, %v738_v43 }
 0x4e3   : > { %2806 = vmatprep.mubr.msk.f32.mxu0 %vm3237_vm2, %v4340_v1 }
 0x4e4   : > { %1951 = vrot.lane.b32.xlu0 %v3428_v62, %s3248_s7 }
 0x4e6   : > { %2807 = vmatmul.mubr.msk.f32.gmra.mxu0 %vm661_vm5, %v739_v23 }
 0x4e7   : > { %2858 = vmatprep.mubr.msk.f32.mxu0 %vm3237_vm2, %v4340_v1 }
 0x506   : > { %v1095_v6 = vpop.xlane.xlu1 %1094  ;;  %v1092_v48 = vpop.xlane.xlu0 %1091 }
 0x507   : > { %3165 = vrcp.f32 %v1092_v48 }
 0x508   : > { %3167 = vrcp.f32 %v1095_v6 }
 0x50a   : > { %v1098_v29 = vpop.xlane.xlu1 %1097  ;;  %v1104_v38 = vpop.xlane.xlu0 %1103 }
 0x50b   : > { %3169 = vrcp.f32 %v1098_v29 }
 0x50e   : > { %v1101_v62 = vpop.xlane.xlu1 %1100 }
 0x50f   : > { %3171 = vrcp.f32 %v1101_v62 }
 0x510   : > { %3173 = vrcp.f32 %v1104_v38 }
 0x512   : > { %v1107_v11 = vpop.xlane.xlu1 %1106 }
 0x513   : > { %3175 = vrcp.f32 %v1107_v11 }
 0x514   : > { %v3166_v17 = vpop.eup %3165 }
 0x515   : > { %v1118_v8 = vmul.f32 %v3166_v17, %v3860_v33  ;;  %v3168_v59 = vpop.eup %3167  ;;  %v1110_v33 = vpop.xlane.xlu0 %1109 }
 0x516   : > { %v1505_v26 = vpop.xlane.xlu1 %1504  ;;  %v1119_v3 = vmul.f32 %v3168_v59, %v3863_v14  ;;  %3177 = vrcp.f32 %v1110_v33 }
 0x517   : > { %2859 = vmatmul.mubr.msk.f32.vlgmr.msra.gmra.mxu0 %vm661_vm5, %v1118_v8  ;;  %3179 = vrcp.f32 %v1505_v26 }
 0x518   : > { %2915 = vmatpush3.msk.msra.mxu0 %vm781_vm4, %v3801_v13  ;;  %2861 = vmatprep.mubr.msk.f32.mxu0 %vm3237_vm2, %v4340_v1  ;;  %v3170_v28 = vpop.eup %3169 }
 0x519   : > { %2916 = vmatprep.subr.mxu0 %v4340_v1  ;;  %v1120_v51 = vmul.f32 %v3170_v28, %v3867_v25 }
 0x51a   : > { %v4023_v24 = vpop.xlane.xlu1 %1510  ;;  %2917 = vmatpush3.msra.mxu0 %v3791_v2 }
 0x51b   : > { %2918 = vmatprep.subr.mxu0 %v4340_v1  ;;  %2862 = vmatmul.mubr.msk.f32.gmra.mxu0 %vm661_vm5, %v1119_v3 }
 0x51c   : > { %2919 = vmatpush3.msra.mxu0 %v3636_v54  ;;  %2864 = vmatprep.mubr.msk.f32.mxu0 %vm3237_vm2, %v4340_v1  ;;  %v3172_v14 = vpop.eup %3171 }
 0x51d   : > { %2920 = vmatprep.subr.mxu0 %v4340_v1  ;;  %v1121_v2 = vmul.f32 %v3172_v14, %v3883_v61  ;;  %v3174_v35 = vpop.eup %3173 }
 0x51e   : > { %v1514_v13 = vpop.xlane.xlu1 %1513  ;;  %2921 = vmatpush3.msra.mxu0 %v3793_v4 }
 0x51f   : > { %2922 = vmatprep.subr.mxu0 %v4340_v1  ;;  %2865 = vmatmul.mubr.msk.f32.gmra.mxu0 %vm661_vm5, %v1120_v51 }
 0x520   : > { %2923 = vmatpush3.msra.mxu0 %v3795_v7  ;;  %2867 = vmatprep.mubr.msk.f32.mxu0 %vm3237_vm2, %v4340_v1  ;;  %v1122_v7 = vmul.f32 %v3174_v35, %v3872_v41  ;;  %v3176_v25 = vpop.eup %3175 }
 0x521   : > { %2924 = vmatprep.subr.mxu0 %v4340_v1 }
 0x522   : > { %v1520_v54 = vpop.xlane.xlu1 %1519  ;;  %2925 = vmatpush3.msra.mxu0 %v3641_v56  ;;  %v1123_v56 = vmul.f32 %v3176_v25, %v3890_v58 }
 0x523   : > { %2926 = vmatprep.subr.mxu0 %v4340_v1  ;;  %2868 = vmatmul.mubr.msk.f32.gmra.mxu0 %vm661_vm5, %v1121_v2  ;;  %v3178_v61 = vpop.eup %3177 }
 0x524   : > { %2927 = vmatpush3.msra.mxu0 %v3799_v10  ;;  %2870 = vmatprep.mubr.msk.f32.mxu0 %vm3237_vm2, %v4340_v1  ;;  %v1124_v10 = vmul.f32 %v3178_v61, %v3878_v15  ;;  %v3180_v41 = vpop.eup %3179  ;;  %v4341_v15 = vld [vmem:[#allocation3_spill] sm:$0xff] }
 0x525   : > { %2984 = vmatprep.subr.mxu0 %v4340_v1  ;;  %v1531_v44 = vmul.f32 %v3180_v41, %v3895_v20  ;;  %v1956_v20 = vpop.permute.xlu0 %1955 }
 0x526   : > { %v1918_v4 = vpop.xlane.xlu1 %1917 }
 0x527   : > { %2871 = vmatmul.mubr.msk.f32.gmra.mxu0 %vm661_vm5, %v1122_v7 }
 0x528   : > { %2873 = vmatprep.mubr.msk.f32.mxu0 %vm3237_vm2, %v4340_v1 }
 0x52a   : > { %v1924_v40 = vpop.xlane.xlu1 %1923 }
 0x52b   : > { %2874 = vmatmul.mubr.msk.f32.gmra.mxu0 %vm661_vm5, %v1123_v56 }
 0x52c   : > { %2876 = vmatprep.mubr.msk.f32.mxu0 %vm3237_vm2, %v4340_v1 }
 0x52e   : > { %v1927_v53 = vpop.xlane.xlu1 %1926 }
 0x52f   : > { %2877 = vmatmul.mubr.msk.f32.gmra.mxu0 %vm661_vm5, %v1124_v10 }
 0x530   : > { %2928 = vmatprep.mubr.msk.f32.mxu0 %vm3237_vm2, %v4340_v1 }
 0x532   : > { %v4069_v58 = vpop.xlane.xlu1 %1932 }
 0x533   : > { %2929 = vmatmul.mubr.msk.f32.vlgmr.msra.gmra.mxu0 %vm661_vm5, %v1531_v44 }
 0x534   : > { %2985 = vmatpush3.msk.msra.mxu0 %vm781_vm4, %v3825_v21  ;;  %2931 = vmatprep.mubr.msk.f32.mxu0 %vm3237_vm2, %v4340_v1 }
 0x535   : > { %2986 = vmatprep.subr.mxu0 %v4340_v1 }
 0x536   : > { %2987 = vmatpush3.msra.mxu0 %v4341_v15  ;;  %v1954_v21 = vpop.permute.xlu1 %1953 }
 0x537   : > { %2988 = vmatprep.subr.mxu0 %v4340_v1 }
 0x538   : > { %2989 = vmatpush3.msra.mxu0 %v4012_v46 }
 0x539   : > { %2990 = vmatprep.subr.mxu0 %v4340_v1 }
 0x53a   : > { %2991 = vmatpush3.msra.mxu0 %v4014_v27 }
 0x53b   : > { %2992 = vmatprep.subr.mxu0 %v4340_v1 }
 0x53c   : > { %2993 = vmatpush3.msra.mxu0 %v1956_v20 }
 0x53d   : > { %2994 = vmatprep.subr.mxu0 %v4340_v1 }
 0x53e   : > { %2995 = vmatpush3.msra.mxu0 %v1954_v21 }
 0x53f   : > { %2996 = vmatprep.subr.mxu0 %v4340_v1 }
 0x543   : > { %v1508_v50 = vpop.xlane.xlu0 %1507 }
 0x544   : > { %3181 = vrcp.f32 %v1508_v50 }
 0x545   : > { %3183 = vrcp.f32 %v4023_v24 }
 0x546   : > { %3185 = vrcp.f32 %v1514_v13 }
 0x547   : > { %v1517_v22 = vpop.xlane.xlu0 %1516 }
 0x548   : > { %3187 = vrcp.f32 %v1517_v22 }
 0x549   : > { %3189 = vrcp.f32 %v1520_v54 }
 0x54b   : > { %v1523_v5 = vpop.xlane.xlu0 %1522 }
 0x54c   : > { %3191 = vrcp.f32 %v1523_v5 }
 0x54d   : > { %3193 = vrcp.f32 %v1918_v4 }
 0x54f   : > { %v1921_v63 = vpop.xlane.xlu0 %1920 }
 0x550   : > { %3195 = vrcp.f32 %v1921_v63 }
 0x551   : > { %v3182_v16 = vpop.eup %3181  ;;  %3197 = vrcp.f32 %v1924_v40 }
 0x552   : > { %v1532_v60 = vmul.f32 %v3182_v16, %v3968_v9  ;;  %v3184_v36 = vpop.eup %3183  ;;  %3199 = vrcp.f32 %v1927_v53 }
 0x553   : > { %v1930_v47 = vpop.xlane.xlu0 %1929  ;;  %v1533_v30 = vmul.f32 %v3184_v36, %v3900_v42  ;;  %v3186_v0 = vpop.eup %3185 }
 0x554   : > { %2932 = vmatmul.mubr.msk.f32.gmra.mxu0 %vm661_vm5, %v1532_v60  ;;  %v1534_v9 = vmul.f32 %v3186_v0, %v3905_v57  ;;  %3201 = vrcp.f32 %v1930_v47 }
 0x555   : > { %2934 = vmatprep.mubr.msk.f32.mxu0 %vm3237_vm2, %v4340_v1  ;;  %v3188_v43 = vpop.eup %3187  ;;  %3203 = vrcp.f32 %v4069_v58 }
 0x556   : > { %v1535_v42 = vmul.f32 %v3188_v43, %v3976_v12  ;;  %v3190_v23 = vpop.eup %3189 }
 0x557   : > { %v1936_v52 = vpop.xlane.xlu0 %1935  ;;  %v1536_v57 = vmul.f32 %v3190_v23, %v3909_v18 }
 0x558   : > { %2935 = vmatmul.mubr.msk.f32.gmra.mxu0 %vm661_vm5, %v1533_v30  ;;  %3205 = vrcp.f32 %v1936_v52 }
 0x559   : > { %2937 = vmatprep.mubr.msk.f32.mxu0 %vm3237_vm2, %v4340_v1  ;;  %v3192_v46 = vpop.eup %3191 }
 0x55a   : > { %v1537_v12 = vmul.f32 %v3192_v46, %v3982_v55  ;;  %v3194_v27 = vpop.eup %3193 }
 0x55b   : > { %v1952_v31 = vpop.permute.xlu0 %1951  ;;  %v1944_v48 = vmul.f32 %v3194_v27, %v3913_v45 }
 0x55c   : > { %2938 = vmatmul.mubr.msk.f32.gmra.mxu0 %vm661_vm5, %v1534_v9 }
 0x55d   : > { %2997 = vmatpush3.msra.mxu0 %v1952_v31  ;;  %2940 = vmatprep.mubr.msk.f32.mxu0 %vm3237_vm2, %v4340_v1  ;;  %v3196_v18 = vpop.eup %3195 }
 0x55e   : > { %3019 = vmatprep.subr.mxu0 %v4340_v1  ;;  %v1945_v55 = vmul.f32 %v3196_v18, %v3986_v32  ;;  %v3198_v11 = vpop.eup %3197 }
 0x55f   : > { %v1946_v17 = vmul.f32 %v3198_v11, %v3919_v19  ;;  %v3200_v8 = vpop.eup %3199 }
 0x560   : > { %2941 = vmatmul.mubr.msk.f32.gmra.mxu0 %vm661_vm5, %v1535_v42  ;;  %v1947_v32 = vmul.f32 %v3200_v8, %v3923_v37 }
 0x561   : > { %2943 = vmatprep.mubr.msk.f32.mxu0 %vm3237_vm2, %v4340_v1  ;;  %v3202_v24 = vpop.eup %3201 }
 0x562   : > { %v1948_v19 = vmul.f32 %v3202_v24, %v3990_v49  ;;  %v3204_v28 = vpop.eup %3203 }
 0x563   : > { %v1949_v33 = vmul.f32 %v3204_v28, %v3929_v39 }
 0x564   : > { %2944 = vmatmul.mubr.msk.f32.gmra.mxu0 %vm661_vm5, %v1536_v57 }
 0x565   : > { %2946 = vmatprep.mubr.msk.f32.mxu0 %vm3237_vm2, %v4340_v1  ;;  %v3206_v13 = vpop.eup %3205 }
 0x566   : > { %v1950_v37 = vmul.f32 %v3206_v13, %v3994_v34 }
 0x568   : > { %2947 = vmatmul.mubr.msk.f32.gmra.mxu0 %vm661_vm5, %v1537_v12 }
 0x569   : > { %v850_v6 = vpop.f32.mrf.mxu0  ;;  %2998 = vmatprep.mubr.msk.f32.mxu0 %vm3237_vm2, %v4340_v1 }
 0x56a   : > { %884 = vst.msk [vmem:[#allocation2] sm:$0xff] %vm532_vm3, %v850_v6 }
 0x56b   : > { %v2790_v29 = vpop.f32.mrf.mxu0 }
 0x56c   : > { %2999 = vmatmul.mubr.msk.f32.vlgmr.msra.gmra.mxu0 %vm661_vm5, %v1944_v48 }
 0x56d   : > { %v855_v62 = vpop.f32.mrf.mxu0  ;;  %3001 = vmatprep.mubr.msk.f32.mxu0 %vm3237_vm2, %v4340_v1 }
 0x56e   : > { %885 = vst.msk [vmem:[#allocation2 + $0x8] sm:$0xff] %vm532_vm3, %v855_v62 }
 0x56f   : > { %v2793_v38 = vpop.f32.mrf.mxu0 }
 0x570   : > { %3002 = vmatmul.mubr.msk.f32.gmra.mxu0 %vm661_vm5, %v1945_v55 }
 0x571   : > { %v860_v45 = vpop.f32.mrf.mxu0  ;;  %3004 = vmatprep.mubr.msk.f32.mxu0 %vm3237_vm2, %v4340_v1 }
 0x572   : > { %886 = vst.msk [vmem:[#allocation2 + $0x10] sm:$0xff] %vm532_vm3, %v860_v45 }
 0x573   : > { %v2796_v26 = vpop.f32.mrf.mxu0 }
 0x574   : > { %3005 = vmatmul.mubr.msk.f32.gmra.mxu0 %vm661_vm5, %v1946_v17 }
 0x575   : > { %v865_v59 = vpop.f32.mrf.mxu0  ;;  %3007 = vmatprep.mubr.msk.f32.mxu0 %vm3237_vm2, %v4340_v1 }
 0x576   : > { %887 = vst.msk [vmem:[#allocation2 + $0x18] sm:$0xff] %vm532_vm3, %v865_v59 }
 0x577   : > { %v2799_v3 = vpop.f32.mrf.mxu0 }
 0x578   : > { %3008 = vmatmul.mubr.msk.f32.gmra.mxu0 %vm661_vm5, %v1947_v32 }
 0x579   : > { %3010 = vmatprep.mubr.msk.f32.mxu0 %vm3237_vm2, %v4340_v1 }
 0x57c   : > { %3011 = vmatmul.mubr.msk.f32.gmra.mxu0 %vm661_vm5, %v1948_v19 }
 0x57d   : > { %3013 = vmatprep.mubr.msk.f32.mxu0 %vm3237_vm2, %v4340_v1 }
 0x580   : > { %3014 = vmatmul.mubr.msk.f32.gmra.mxu0 %vm661_vm5, %v1949_v33 }
 0x581   : > { %3016 = vmatprep.mubr.msk.f32.mxu0 %vm3237_vm2, %v4340_v1 }
 0x584   : > { %3017 = vmatmul.mubr.msk.f32.gmra.mxu0 %vm661_vm5, %v1950_v37 }
 0x585   : > { %3027 = vmatprep.mubr.msk.f32.mxu0 %vm3237_vm2, %v4340_v1 }
 0x59e   : > { %v870_v49 = vpop.f32.mrf.mxu0 }
 0x59f   : > { %888 = vst.msk [vmem:[#allocation2 + $0x20] sm:$0xff] %vm532_vm3, %v870_v49 }
 0x5a0   : > { %v2802_v51 = vpop.f32.mrf.mxu0 }
 0x5a2   : > { %v875_v14 = vpop.f32.mrf.mxu0 }
 0x5a3   : > { %889 = vst.msk [vmem:[#allocation2 + $0x28] sm:$0xff] %vm532_vm3, %v875_v14 }
 0x5a4   : > { %v2805_v39 = vpop.f32.mrf.mxu0 }
 0x5a5   : > { %v3221_v39 = vld [vmem:[%s3303_s26 + $0x10] sm:$0xff] }
 0x5a6   : > { %v880_v54 = vpop.f32.mrf.mxu0 }
 0x5a7   : > { %891 = vst.msk [vmem:[#allocation2 + $0x30] sm:$0x3] %vm890_vm7, %v880_v54 }
 0x5a8   : > { %v2808_v2 = vpop.f32.mrf.mxu0 }
 0x5d7   : > { %v1234_v35 = vpop.f32.mrf.mxu0 }
 0x5d8   : > { %1275 = vrot.lane.b32.xlu0 %v1234_v35, %s3249_s8  ;;  %v3222_v35 = vld [vmem:[%s3303_s26] sm:$0xff] }
 0x5d9   : > { %v2860_v34 = vpop.f32.mrf.mxu0 }
 0x5db   : > { %v1239_v4 = vpop.f32.mrf.mxu0 }
 0x5dd   : > { %v2863_v7 = vpop.f32.mrf.mxu0 }
 0x5df   : > { %v1244_v25 = vpop.f32.mrf.mxu0 }
 0x5e0   : > { %1279 = vrot.lane.b32.xlu1 %v1244_v25, %s3249_s8 }
 0x5e1   : > { %v2866_v56 = vpop.f32.mrf.mxu0 }
 0x5e2   : > { %v3223_v56 = vld [vmem:[%s3303_s26 + $0x18] sm:$0xff] }
 0x5e3   : > { %v1249_v61 = vpop.f32.mrf.mxu0 }
 0x5e4   : > { %1281 = vrot.lane.b32.xlu1 %v1249_v61, %s3249_s8 }
 0x5e5   : > { %v2869_v40 = vpop.f32.mrf.mxu0 }
 0x5e7   : > { %v1254_v10 = vpop.f32.mrf.mxu0 }
 0x5e8   : > { %1283 = vrot.lane.b32.xlu1 %v1254_v10, %s3249_s8 }
 0x5e9   : > { %v2872_v41 = vpop.f32.mrf.mxu0 }
 0x5eb   : > { %v1259_v44 = vpop.f32.mrf.mxu0 }
 0x5ec   : > { %1285 = vrot.lane.b32.xlu1 %v1259_v44, %s3249_s8 }
 0x5ed   : > { %v2875_v53 = vpop.f32.mrf.mxu0 }
 0x5ef   : > { %v1264_v15 = vpop.f32.mrf.mxu0 }
 0x5f1   : > { %v2878_v58 = vpop.f32.mrf.mxu0 }
 0x5f2   : > { %v3224_v58 = vld [vmem:[%s3303_s26 + $0x20] sm:$0xff] }
 0x5f3   : > { %v1647_v20 = vpop.f32.mrf.mxu0 }
 0x5f4   : > { %1688 = vrot.lane.b32.xlu0 %v1647_v20, %s3250_s9 }
 0x5f5   : > { %v2930_v21 = vpop.f32.mrf.mxu0 }
 0x614   : > { %v1652_v50 = vpop.f32.mrf.mxu0 }
 0x616   : > { %v2933_v22 = vpop.f32.mrf.mxu0 }
 0x618   : > { %v1657_v5 = vpop.f32.mrf.mxu0 }
 0x619   : > { %1692 = vrot.lane.b32.xlu1 %v1657_v5, %s3250_s9  ;;  %v3225_v5 = vld [vmem:[%s3303_s26 + $0x28] sm:$0xff] }
 0x61a   : > { %v2936_v63 = vpop.f32.mrf.mxu0 }
 0x61c   : > { %v1662_v16 = vpop.f32.mrf.mxu0 }
 0x61d   : > { %1694 = vrot.lane.b32.xlu1 %v1662_v16, %s3250_s9  ;;  %v3226_v16 = vld [vmem:[%s3303_s26 + $0x8] sm:$0xff] }
 0x61e   : > { %v2939_v60 = vpop.f32.mrf.mxu0 }
 0x620   : > { %v1667_v36 = vpop.f32.mrf.mxu0 }
 0x621   : > { %1696 = vrot.lane.b32.xlu0 %v1667_v36, %s3250_s9 }
 0x622   : > { %v2942_v47 = vpop.f32.mrf.mxu0 }
 0x624   : > { %v1672_v30 = vpop.f32.mrf.mxu0 }
 0x625   : > { %1698 = vrot.lane.b32.xlu1 %v1672_v30, %s3250_s9 }
 0x626   : > { %v2945_v0 = vpop.f32.mrf.mxu0 }
 0x627   : > { %v3227_v0 = vld [vmem:[%s3303_s26 + $0x30] sm:$0x3] }
 0x628   : > { %v1677_v52 = vpop.f32.mrf.mxu0 }
 0x62a   : > { %v2948_v9 = vpop.f32.mrf.mxu0 }
 0x62c   : > { %v2060_v43 = vpop.f32.mrf.mxu0 }
 0x62d   : > { %2101 = vrot.lane.b32.xlu0 %v2060_v43, %s3251_s10 }
 0x62e   : > { %v3000_v31 = vpop.f32.mrf.mxu0 }
 0x630   : > { %v2065_v42 = vpop.f32.mrf.mxu0 }
 0x632   : > { %v3003_v23 = vpop.f32.mrf.mxu0 }
 0x634   : > { %v2070_v57 = vpop.f32.mrf.mxu0 }
 0x635   : > { %2105 = vrot.lane.b32.xlu1 %v2070_v57, %s3251_s10 }
 0x636   : > { %v3006_v46 = vpop.f32.mrf.mxu0 }
 0x638   : > { %v2075_v12 = vpop.f32.mrf.mxu0 }
 0x639   : > { %1287 = vrot.lane.b32.xlu1 %v1264_v15, %s3249_s8  ;;  %2107 = vrot.lane.b32.xlu0 %v2075_v12, %s3251_s10 }
 0x63a   : > { %v3009_v27 = vpop.f32.mrf.mxu0 }
 0x63c   : > { %v2080_v6 = vpop.f32.mrf.mxu0 }
 0x63d   : > { %1700 = vrot.lane.b32.xlu1 %v1677_v52, %s3250_s9  ;;  %1277 = vrot.lane.b32.xlu0 %v1239_v4, %s3249_s8 }
 0x63e   : > { %v3012_v48 = vpop.f32.mrf.mxu0 }
 0x640   : > { %v2085_v18 = vpop.f32.mrf.mxu0 }
 0x641   : > { %1690 = vrot.lane.b32.xlu0 %v1652_v50, %s3250_s9  ;;  %2109 = vrot.lane.b32.xlu1 %v2080_v6, %s3251_s10 }
 0x642   : > { %v3015_v29 = vpop.f32.mrf.mxu0 }
 0x644   : > { %v2090_v62 = vpop.f32.mrf.mxu0 }
 0x645   : > { %2103 = vrot.lane.b32.xlu0 %v2065_v42, %s3251_s10  ;;  %2111 = vrot.lane.b32.xlu1 %v2085_v18, %s3251_s10 }
 0x646   : > { %v3018_v55 = vpop.f32.mrf.mxu0 }
 0x649   : > { %2113 = vrot.lane.b32.xlu1 %v2090_v62, %s3251_s10 }
 0x64a   : > { %v1276_v11 = vpop.permute.xlu0 %1275 }
 0x64b   : > { %1297 = vst.msk [vmem:[#allocation2] sm:$0xff] %vm1296_vm8, %v1276_v11 }
 0x652   : > { %v1280_v38 = vpop.permute.xlu1 %1279 }
 0x653   : > { %1299 = vst.msk [vmem:[#allocation2 + $0x10] sm:$0xff] %vm1296_vm8, %v1280_v38 }
 0x656   : > { %v1282_v45 = vpop.permute.xlu1 %1281 }
 0x657   : > { %1300 = vst.msk [vmem:[#allocation2 + $0x18] sm:$0xff] %vm1296_vm8, %v1282_v45 }
 0x65a   : > { %v1284_v17 = vpop.permute.xlu1 %1283 }
 0x65b   : > { %1301 = vst.msk [vmem:[#allocation2 + $0x20] sm:$0xff] %vm1296_vm8, %v1284_v17 }
 0x65e   : > { %v1286_v8 = vpop.permute.xlu1 %1285 }
 0x65f   : > { %1302 = vst.msk [vmem:[#allocation2 + $0x28] sm:$0xff] %vm1296_vm8, %v1286_v8 }
 0x666   : > { %v1689_v26 = vpop.permute.xlu0 %1688 }
 0x667   : > { %1710 = vst.msk [vmem:[#allocation2] sm:$0xff] %vm1709_vm9, %v1689_v26 }
 0x68b   : > { %v1693_v59 = vpop.permute.xlu1 %1692 }
 0x68c   : > { %1712 = vst.msk [vmem:[#allocation2 + $0x10] sm:$0xff] %vm1709_vm9, %v1693_v59 }
 0x68f   : > { %v1695_v32 = vpop.permute.xlu1 %1694 }
 0x690   : > { %1713 = vst.msk [vmem:[#allocation2 + $0x18] sm:$0xff] %vm1709_vm9, %v1695_v32 }
 0x693   : > { %v1697_v24 = vpop.permute.xlu0 %1696 }
 0x694   : > { %1714 = vst.msk [vmem:[#allocation2 + $0x20] sm:$0xff] %vm1709_vm9, %v1697_v24 }
 0x697   : > { %v1699_v3 = vpop.permute.xlu1 %1698 }
 0x698   : > { %1715 = vst.msk [vmem:[#allocation2 + $0x28] sm:$0xff] %vm1709_vm9, %v1699_v3 }
 0x69f   : > { %v2102_v19 = vpop.permute.xlu0 %2101 }
 0x6a0   : > { %2123 = vst.msk [vmem:[#allocation2] sm:$0xff] %vm2122_vm10, %v2102_v19 }
 0x6a7   : > { %v2106_v28 = vpop.permute.xlu1 %2105  ;;  %v2131_v14 = vld [vmem:[#allocation2] sm:$0xff] }
 0x6a8   : > { %2125 = vst.msk [vmem:[#allocation2 + $0x10] sm:$0xff] %vm2122_vm10, %v2106_v28  ;;  %v4173_v34 = vadd.f32 %v3222_v35, %v2131_v14 }
 0x6aa   : > { %v2145_v40 = vsel %vm263_vm0, %v4173_v34, 0.0 }
 0x6ab   : > { %v1288_v33 = vpop.permute.xlu1 %1287  ;;  %v2108_v13 = vpop.permute.xlu0 %2107 }
 0x6ac   : > { %1304 = vst.msk [vmem:[#allocation2 + $0x30] sm:$0x3] %vm1303_vm11, %v1288_v33 }
 0x6ad   : > { %2126 = vst.msk [vmem:[#allocation2 + $0x18] sm:$0xff] %vm2122_vm10, %v2108_v13 }
 0x6af   : > { %v1701_v37 = vpop.permute.xlu1 %1700  ;;  %v1278_v49 = vpop.permute.xlu0 %1277  ;;  %v2133_v51 = vld [vmem:[#allocation2 + $0x10] sm:$0xff] }
 0x6b0   : > { %1717 = vst.msk [vmem:[#allocation2 + $0x30] sm:$0x3] %vm1716_vm12, %v1701_v37  ;;  %v4168_v54 = vadd.f32 %v3221_v39, %v2133_v51 }
 0x6b1   : > { %1298 = vst.msk [vmem:[#allocation2 + $0x8] sm:$0xff] %vm1296_vm8, %v1278_v49 }
 0x6b2   : > { %v2151_v2 = vsel %vm263_vm0, %v4168_v54, 0.0 }
 0x6b3   : > { %2152 = vadd.xlane.f32.xlu0 %v2151_v2  ;;  %v1691_v4 = vpop.permute.xlu0 %1690  ;;  %v2110_v7 = vpop.permute.xlu1 %2109 }
 0x6b4   : > { %v2134_v25 = vld [vmem:[#allocation2 + $0x18] sm:$0xff]  ;;  %1711 = vst.msk [vmem:[#allocation2 + $0x8] sm:$0xff] %vm1709_vm9, %v1691_v4 }
 0x6b5   : > { %2127 = vst.msk [vmem:[#allocation2 + $0x20] sm:$0xff] %vm2122_vm10, %v2110_v7  ;;  %v4178_v61 = vadd.f32 %v3223_v56, %v2134_v25  ;;  %v2261_v4 = vld [vmem:[%s4334_s4 + $0x18] sm:$0xff]  ;;  %v2260_v7 = vld [vmem:[%s4334_s4 + $0x10] sm:$0xff]  ;;  %v2259_v25 = vld [vmem:[%s4334_s4 + $0x8] sm:$0xff] }
 0x6b6   : > { %3052 = vmatpush3.msra.mxu1 %v2261_v4  ;;  %3020 = vmatpush3.msra.mxu0 %v2261_v4  ;;  %v2258_v56 = vld [vmem:[%s4334_s4] sm:$0xff] }
 0x6b7   : > { %v2154_v10 = vsel %vm263_vm0, %v4178_v61, 0.0  ;;  %2146 = vadd.xlane.f32.xlu0 %v2145_v40  ;;  %v2104_v41 = vpop.permute.xlu0 %2103  ;;  %v2112_v44 = vpop.permute.xlu1 %2111  ;;  %3049 = vmatprep.subr.mxu1 %v4340_v1 }
 0x6b8   : > { %2155 = vadd.xlane.f32.xlu1 %v2154_v10  ;;  %2124 = vst.msk [vmem:[#allocation2 + $0x8] sm:$0xff] %vm2122_vm10, %v2104_v41  ;;  %2128 = vst.msk [vmem:[#allocation2 + $0x28] sm:$0xff] %vm2122_vm10, %v2112_v44  ;;  %3021 = vmatprep.subr.mxu0 %v4340_v1 }
 0x6b9   : > { %3053 = vmatpush3.msra.mxu1 %v2260_v7  ;;  %3022 = vmatpush3.msra.mxu0 %v2260_v7 }
 0x6ba   : > { %3050 = vmatprep.subr.mxu1 %v4340_v1  ;;  %3023 = vmatprep.subr.mxu0 %v4340_v1 }
 0x6bb   : > { %v2114_v53 = vpop.permute.xlu1 %2113  ;;  %3054 = vmatpush3.msra.mxu1 %v2259_v25  ;;  %3024 = vmatpush3.msra.mxu0 %v2259_v25 }
 0x6bc   : > { %v2135_v15 = vld [vmem:[#allocation2 + $0x20] sm:$0xff]  ;;  %2130 = vst.msk [vmem:[#allocation2 + $0x30] sm:$0x3] %vm2129_vm13, %v2114_v53  ;;  %3051 = vmatprep.subr.mxu1 %v4340_v1  ;;  %3025 = vmatprep.subr.mxu0 %v4340_v1 }
 0x6bd   : > { %v4187_v20 = vadd.f32 %v3224_v58, %v2135_v15  ;;  %3055 = vmatpush3.msra.mxu1 %v2258_v56  ;;  %3026 = vmatpush3.msra.mxu0 %v2258_v56 }
 0x6bf   : > { %v2157_v21 = vsel %vm263_vm0, %v4187_v20, 0.0  ;;  %v2136_v50 = vld [vmem:[#allocation2 + $0x28] sm:$0xff] }
 0x6c0   : > { %2158 = vadd.xlane.f32.xlu0 %v2157_v21  ;;  %v2132_v22 = vld [vmem:[#allocation2 + $0x8] sm:$0xff]  ;;  %v4192_v63 = vadd.f32 %v3225_v5, %v2136_v50 }
 0x6c1   : > { %v4195_v60 = vadd.f32 %v3226_v16, %v2132_v22 }
 0x6c2   : > { %v2160_v36 = vsel %vm263_vm0, %v4192_v63, 0.0 }
 0x6c3   : > { %v2148_v47 = vsel %vm263_vm0, %v4195_v60, 0.0  ;;  %v2137_v30 = vld [vmem:[#allocation2 + $0x30] sm:$0x3] }
 0x6c4   : > { %2161 = vadd.xlane.f32.xlu0 %v2160_v36  ;;  %2149 = vadd.xlane.f32.xlu1 %v2148_v47  ;;  %v4202_v52 = vadd.f32 %v3227_v0, %v2137_v30 }
 0x6c6   : > { %v2163_v9 = vsel %vm282_vm1, %v4202_v52, 0.0 }
 0x6c8   : > { %2164 = vadd.xlane.f32.xlu0 %v2163_v9 }
 0x73c   : > { %v2153_v43 = vpop.xlane.xlu0 %2152 }
 0x73d   : > { %v2168_v31 = vmul.f32 0.03125, %v2153_v43  ;;  %v2564_v43 = vld [vmem:[%s4331_s1 + $0x2] ss:$0 sm:$0xff] }
 0x73f   : > { %v4207_v42 = vsub.f32 %v4168_v54, %v2168_v31 }
 0x740   : > { %v2147_v23 = vpop.xlane.xlu0 %2146 }
 0x741   : > { %v2156_v57 = vpop.xlane.xlu1 %2155  ;;  %v2166_v46 = vmul.f32 0.03125, %v2147_v23  ;;  %v2182_v27 = vmul.f32 %v4207_v42, %v4207_v42 }
 0x742   : > { %v2169_v12 = vmul.f32 0.03125, %v2156_v57 }
 0x743   : > { %v4212_v6 = vsub.f32 %v4173_v34, %v2166_v46  ;;  %v2193_v18 = vsel %vm263_vm0, %v2182_v27, 0.0 }
 0x744   : > { %v4215_v48 = vsub.f32 %v4178_v61, %v2169_v12  ;;  %2194 = vadd.xlane.f32.xlu1 %v2193_v18  ;;  %v2565_v12 = vld [vmem:[%s4331_s1 + $0x3] ss:$0 sm:$0xff] }
 0x745   : > { %v2180_v55 = vmul.f32 %v4212_v6, %v4212_v6 }
 0x746   : > { %v2183_v29 = vmul.f32 %v4215_v48, %v4215_v48 }
 0x747   : > { %v2187_v17 = vsel %vm263_vm0, %v2180_v55, 0.0 }
 0x748   : > { %v2196_v62 = vsel %vm263_vm0, %v2183_v29, 0.0 }
 0x749   : > { %v2159_v11 = vpop.xlane.xlu0 %2158  ;;  %2197 = vadd.xlane.f32.xlu0 %v2196_v62 }
 0x74a   : > { %v2170_v38 = vmul.f32 0.03125, %v2159_v11 }
 0x74c   : > { %v4224_v45 = vsub.f32 %v4187_v20, %v2170_v38 }
 0x74d   : > { %v2162_v8 = vpop.xlane.xlu0 %2161  ;;  %2188 = vadd.xlane.f32.xlu0 %v2187_v17  ;;  %v2150_v26 = vpop.xlane.xlu1 %2149 }
 0x74e   : > { %v2171_v59 = vmul.f32 0.03125, %v2162_v8  ;;  %v2167_v32 = vmul.f32 0.03125, %v2150_v26  ;;  %v2184_v24 = vmul.f32 %v4224_v45, %v4224_v45 }
 0x750   : > { %v4230_v3 = vsub.f32 %v4192_v63, %v2171_v59  ;;  %v4233_v19 = vsub.f32 %v4195_v60, %v2167_v32  ;;  %v2199_v28 = vsel %vm263_vm0, %v2184_v24, 0.0 }
 0x751   : > { %2200 = vadd.xlane.f32.xlu1 %v2199_v28  ;;  %v2165_v33 = vpop.xlane.xlu0 %2164 }
 0x752   : > { %v2172_v13 = vmul.f32 0.03125, %v2165_v33  ;;  %v2185_v37 = vmul.f32 %v4230_v3, %v4230_v3  ;;  %v2181_v49 = vmul.f32 %v4233_v19, %v4233_v19 }
 0x754   : > { %v4241_v51 = vsub.f32 %v4202_v52, %v2172_v13  ;;  %v2202_v14 = vsel %vm263_vm0, %v2185_v37, 0.0  ;;  %v2190_v39 = vsel %vm263_vm0, %v2181_v49, 0.0 }
 0x755   : > { %2203 = vadd.xlane.f32.xlu1 %v2202_v14  ;;  %2191 = vadd.xlane.f32.xlu0 %v2190_v39 }
 0x756   : > { %v2186_v2 = vmul.f32 %v4241_v51, %v4241_v51 }
 0x758   : > { %v2205_v35 = vsel %vm282_vm1, %v2186_v2, 0.0 }
 0x759   : > { %2206 = vadd.xlane.f32.xlu1 %v2205_v35 }
 0x7cd   : > { %v2195_v40 = vpop.xlane.xlu1 %2194 }
 0x7ce   : > { %v2210_v10 = vmul.f32 0.03125, %v2195_v40 }
 0x7d0   : > { %v2217_v41 = vadd.f32 1e-05, %v2210_v10 }
 0x7d2   : > { %v2198_v44 = vpop.xlane.xlu0 %2197  ;;  %3207 = vrsqrt.f32 %v2217_v41 }
 0x7d3   : > { %v2211_v53 = vmul.f32 0.03125, %v2198_v44 }
 0x7d5   : > { %v2218_v15 = vadd.f32 1e-05, %v2211_v53 }
 0x7d6   : > { %v2189_v58 = vpop.xlane.xlu0 %2188 }
 0x7d7   : > { %3209 = vrsqrt.f32 %v2218_v15  ;;  %v2208_v21 = vmul.f32 0.03125, %v2189_v58 }
 0x7d9   : > { %v2215_v50 = vadd.f32 1e-05, %v2208_v21 }
 0x7da   : > { %v2201_v22 = vpop.xlane.xlu1 %2200 }
 0x7db   : > { %3211 = vrsqrt.f32 %v2215_v50  ;;  %v2212_v5 = vmul.f32 0.03125, %v2201_v22 }
 0x7dd   : > { %v2219_v16 = vadd.f32 1e-05, %v2212_v5 }
 0x7de   : > { %v2192_v36 = vpop.xlane.xlu0 %2191  ;;  %v2204_v47 = vpop.xlane.xlu1 %2203 }
 0x7df   : > { %3213 = vrsqrt.f32 %v2219_v16  ;;  %v2209_v30 = vmul.f32 0.03125, %v2192_v36  ;;  %v2213_v0 = vmul.f32 0.03125, %v2204_v47  ;;  %v3208_v9 = vpop.eup %3207 }
 0x7e0   : > { %v2231_v31 = vmul.f32 %v3208_v9, %v4207_v42 }
 0x7e1   : > { %v2216_v23 = vadd.f32 1e-05, %v2209_v30  ;;  %v2220_v57 = vadd.f32 1e-05, %v2213_v0 }
 0x7e2   : > { %v2207_v46 = vpop.xlane.xlu1 %2206  ;;  %v2242_v27 = vmul.f32 %v2564_v43, %v2231_v31 }
 0x7e3   : > { %3215 = vrsqrt.f32 %v2216_v23  ;;  %v2214_v18 = vmul.f32 0.03125, %v2207_v46 }
 0x7e4   : > { %v3210_v29 = vpop.eup %3209  ;;  %3217 = vrsqrt.f32 %v2220_v57  ;;  %v2253_v55 = vadd.f32 %v2565_v12, %v2242_v27 }
 0x7e5   : > { %v2221_v62 = vadd.f32 1e-05, %v2214_v18  ;;  %v2232_v11 = vmul.f32 %v3210_v29, %v4215_v48 }
 0x7e6   : > { %3034 = vmatmul.mubr.msk.f32.vlgmr.msra.gmra.mxu1 %vm263_vm0, %v2253_v55 }
 0x7e7   : > { %3219 = vrsqrt.f32 %v2221_v62  ;;  %v2243_v42 = vmul.f32 %v2564_v43, %v2232_v11  ;;  %3036 = vmatprep.mubr.msk.f32.mxu1 %vm3237_vm2, %v4340_v1 }
 0x7e8   : > { %v3212_v38 = vpop.eup %3211 }
 0x7e9   : > { %v2229_v17 = vmul.f32 %v3212_v38, %v4212_v6  ;;  %v2254_v8 = vadd.f32 %v2565_v12, %v2243_v42 }
 0x7eb   : > { %v2240_v26 = vmul.f32 %v2564_v43, %v2229_v17  ;;  %3037 = vmatmul.mubr.msk.f32.gmra.mxu1 %vm263_vm0, %v2254_v8 }
 0x7ec   : > { %v3214_v59 = vpop.eup %3213  ;;  %3039 = vmatprep.mubr.msk.f32.mxu1 %vm3237_vm2, %v4340_v1 }
 0x7ed   : > { %v2251_v32 = vadd.f32 %v2565_v12, %v2240_v26  ;;  %v2233_v48 = vmul.f32 %v3214_v59, %v4224_v45 }
 0x7ef   : > { %3028 = vmatmul.mubr.msk.f32.vlgmr.msra.gmra.mxu0 %vm263_vm0, %v2251_v32  ;;  %v2244_v24 = vmul.f32 %v2564_v43, %v2233_v48 }
 0x7f0   : > { %v3216_v28 = vpop.eup %3215  ;;  %3030 = vmatprep.mubr.msk.f32.mxu0 %vm3237_vm2, %v4340_v1 }
 0x7f1   : > { %v3218_v33 = vpop.eup %3217  ;;  %v2255_v6 = vadd.f32 %v2565_v12, %v2244_v24  ;;  %v2230_v13 = vmul.f32 %v3216_v28, %v4233_v19  ;;  %v2566_v19 = vld [vmem:[%s4335_s5] ss:$0 sm:$0xff] }
 0x7f2   : > { %v2234_v37 = vmul.f32 %v3218_v33, %v4230_v3 }
 0x7f3   : > { %3040 = vmatmul.mubr.msk.f32.gmra.mxu1 %vm263_vm0, %v2255_v6  ;;  %v2241_v49 = vmul.f32 %v2564_v43, %v2230_v13 }
 0x7f4   : > { %v3220_v14 = vpop.eup %3219  ;;  %3042 = vmatprep.mubr.msk.f32.mxu1 %vm3237_vm2, %v4340_v1  ;;  %v2245_v45 = vmul.f32 %v2564_v43, %v2234_v37 }
 0x7f5   : > { %v2252_v39 = vadd.f32 %v2565_v12, %v2241_v49  ;;  %v2235_v2 = vmul.f32 %v3220_v14, %v4241_v51 }
 0x7f6   : > { %v2256_v35 = vadd.f32 %v2565_v12, %v2245_v45 }
 0x7f7   : > { %3031 = vmatmul.mubr.msk.f32.gmra.mxu0 %vm263_vm0, %v2252_v39  ;;  %v2246_v4 = vmul.f32 %v2564_v43, %v2235_v2 }
 0x7f8   : > { %3043 = vmatmul.mubr.msk.f32.gmra.mxu1 %vm263_vm0, %v2256_v35 }
 0x7f9   : > { %3045 = vmatprep.mubr.msk.f32.mxu1 %vm3237_vm2, %v4340_v1  ;;  %v2257_v3 = vadd.f32 %v2565_v12, %v2246_v4 }
 0x7fc   : > { %3046 = vmatmul.mubr.msk.f32.gmra.mxu1 %vm263_vm0, %v2257_v3 }
 0x8a6   : > { %v2366_v7 = vpop.f32.mrf.mxu1 }
 0x8a7   : > { %v2367_v25 = vadd.f32 %v2566_v19, %v2366_v7 }
 0x8a8   : > { %v3035_v51 = vpop.f32.mrf.mxu1 }
 0x8a9   : > { %v2392_v1 = vadd.f32 %v2367_v25, %v4168_v54 }
 0x8ab   : > { %v2371_v56 = vpop.f32.mrf.mxu1  ;;  %2399 = vst.msk [vmem:[%s4304_s30 + $0x10] sm:$0xff] %vm263_vm0, %v2392_v1 }
 0x8ac   : > { %v2372_v40 = vadd.f32 %v2566_v19, %v2371_v56 }
 0x8ad   : > { %v3038_v10 = vpop.f32.mrf.mxu1 }
 0x8ae   : > { %v2393_v41 = vadd.f32 %v2372_v40, %v4178_v61 }
 0x8af   : > { %v2356_v44 = vpop.f32.mrf.mxu0 }
 0x8b0   : > { %2400 = vst.msk [vmem:[%s4304_s30 + $0x18] sm:$0xff] %vm263_vm0, %v2393_v41  ;;  %v2357_v53 = vadd.f32 %v2566_v19, %v2356_v44 }
 0x8b1   : > { %v3029_v15 = vpop.f32.mrf.mxu0 }
 0x8b2   : > { %v2390_v58 = vadd.f32 %v2357_v53, %v4173_v34 }
 0x8b3   : > { %v2376_v21 = vpop.f32.mrf.mxu1 }
 0x8b4   : > { %2397 = vst.msk [vmem:[%s4304_s30] sm:$0xff] %vm263_vm0, %v2390_v58  ;;  %v2377_v54 = vadd.f32 %v2566_v19, %v2376_v21 }
 0x8b5   : > { %v3041_v50 = vpop.f32.mrf.mxu1 }
 0x8b6   : > { %v2394_v22 = vadd.f32 %v2377_v54, %v4187_v20 }
 0x8b7   : > { %v2361_v5 = vpop.f32.mrf.mxu0 }
 0x8b8   : > { %2401 = vst.msk [vmem:[%s4304_s30 + $0x20] sm:$0xff] %vm263_vm0, %v2394_v22  ;;  %v2362_v61 = vadd.f32 %v2566_v19, %v2361_v5  ;;  %v2381_v16 = vpop.f32.mrf.mxu1 }
 0x8b9   : > { %v2382_v36 = vadd.f32 %v2566_v19, %v2381_v16  ;;  %v3032_v47 = vpop.f32.mrf.mxu0 }
 0x8ba   : > { %v2391_v30 = vadd.f32 %v2362_v61, %v4195_v60  ;;  %v3044_v0 = vpop.f32.mrf.mxu1 }
 0x8bb   : > { %v2395_v34 = vadd.f32 %v2382_v36, %v4192_v63 }
 0x8bc   : > { %2398 = vst.msk [vmem:[%s4304_s30 + $0x8] sm:$0xff] %vm263_vm0, %v2391_v30  ;;  %v2386_v9 = vpop.f32.mrf.mxu1 }
 0x8bd   : > { %2402 = vst.msk [vmem:[%s4304_s30 + $0x28] sm:$0xff] %vm263_vm0, %v2395_v34  ;;  %v2387_v43 = vadd.f32 %v2566_v19, %v2386_v9 }
 0x8be   : > { %v3047_v20 = vpop.f32.mrf.mxu1 }
 0x8bf   : > { %v2396_v31 = vadd.f32 %v2387_v43, %v4202_v52 }
 0x8c1   : > { %2403 = vst.msk [vmem:[%s4304_s30 + $0x30] sm:$0x3] %vm282_vm1, %v2396_v31 }
 0x8c2 PF: > { %s16_s21 = sadd.s32 1, %s3234_s21  }
 0x8c3   : > { %p13_p4 = scmp.ge.s32.totalorder %s16_s21, 4  }
 0x8c5   :  { %15 = sbr.rel (!%p13_p4) target bundleno = 1 (0x1), region = 74 }

</bundles_post_ra>
